<compile_context>
chip_gen: v7x
topology: tpu7x:2x2x1
jax: 0.10.0
libtpu: 0.0.40
codegen_flags: <defaults>
</compile_context>

<pallas_src>
import numpy as np
import jax
import jax.numpy as jnp
from jax.experimental import pallas as pl
from jax.experimental.pallas import tpu as pltpu

# ----------------------------- model config ---------------------------------
N_BATCH   = 2
C, H, W   = 4, 16, 16
N_PATCHES = 4
N_BLOCKS  = 2
HIDDEN_D  = 32
N_HEADS   = 2
OUT_D     = 10

PATCH_SIZE = H // N_PATCHES                      # 4
INPUT_D    = C * PATCH_SIZE * PATCH_SIZE         # 64
N_PP       = N_PATCHES * N_PATCHES               # 16
SEQ_LEN    = N_PP + 1                            # 17
SEQ_PAD    = 24                                  # 17 rounded up to 8-sublane mult
D_HEAD     = HIDDEN_D // N_HEADS                 # 16
LN_EPS     = 1e-5
OUT_PAD    = 128                                 # lane-dense output width

# ----------------------- parameter-slab row layout ---------------------------
# single (P_ROWS, 128) f32 slab; every section starts at a multiple of 8 rows.
R_WMAP = 0                                   # 64 rows, lanes [0:32]   mapper W
R_ADD  = R_WMAP + INPUT_D                    # 64 : 48 rows, lanes [0:32]  cls+pos+bias
R_SCAL = R_ADD + N_BATCH * SEQ_PAD           # 112: 8 rows / block (gamma, beta, b_qkv)
R_WQKV = R_SCAL + 8 * N_BLOCKS               # 128: 32 rows / block, lanes [0:96]
R_WMLP = R_WQKV + N_BLOCKS * HIDDEN_D        # 192: 32 rows, lanes [0:10] real
R_BMLP = R_WMLP + HIDDEN_D                   # 224: 1 row (bias, pad lanes -1e30)
P_ROWS = 232                                 # rounded up to a multiple of 8


# ------------------------------- kernel -------------------------------------
def vit_kernel(patches_ref,   # (N*SEQ_PAD, INPUT_D)  cls/pad rows are zero
               params_ref,    # (P_ROWS, 128)         packed parameter slab
               out_ref):      # (N, 128)
    # Patch embedding for both images in one MXU push; class token, positional
    # embedding and mapper bias arrive pre-folded in the additive section.
    wmap = params_ref[R_WMAP:R_WMAP + INPUT_D, 0:HIDDEN_D]              # (64, 32)
    add  = params_ref[R_ADD:R_ADD + N_BATCH * SEQ_PAD, 0:HIDDEN_D]      # (48, 32)
    x = jnp.dot(patches_ref[...], wmap,
                preferred_element_type=jnp.float32) + add               # (48, 32)

    # static mask for the 7 pad key columns of each 24-row image window
    key_idx  = jax.lax.broadcasted_iota(jnp.int32, (1, SEQ_PAD), 1)
    key_mask = jnp.where(key_idx < SEQ_LEN, 0.0, -1e30).astype(jnp.float32)
    inv_sqrt_dh = 1.0 / (D_HEAD ** 0.5)

    for blk in range(N_BLOCKS):
        # per-block params: one aligned 8-row load, sliced in registers
        r = R_SCAL + 8 * blk
        scal  = params_ref[r:r + 8, :]                                  # (8, 128)
        ln_g  = scal[0:1, 0:HIDDEN_D]
        ln_b  = scal[1:2, 0:HIDDEN_D]
        b_qkv = scal[2:3, 0:3 * HIDDEN_D]
        wqkv  = params_ref[R_WQKV + blk * HIDDEN_D:
                           R_WQKV + (blk + 1) * HIDDEN_D, 0:3 * HIDDEN_D]  # (32, 96)

        # LayerNorm on the whole (48, 32) slab, one-pass variance
        mean = jnp.mean(x, axis=-1, keepdims=True)
        var  = jnp.mean(x * x, axis=-1, keepdims=True) - mean * mean
        xn   = (x - mean) * jax.lax.rsqrt(var + LN_EPS) * ln_g + ln_b

        # fused Q/K/V projection for both images: one (48,32)@(32,96) push
        qkv = jnp.dot(xn, wqkv, preferred_element_type=jnp.float32) + b_qkv  # (48, 96)

        # attention per image / head, all in registers; pad keys masked out
        img_outs = []
        for b in range(N_BATCH):
            base = b * SEQ_PAD
            head_outs = []
            for h in range(N_HEADS):
                lo = h * D_HEAD
                qh = qkv[base:base + SEQ_PAD, lo:lo + D_HEAD]
                kh = qkv[base:base + SEQ_PAD,
                         HIDDEN_D + lo:HIDDEN_D + lo + D_HEAD]
                vh = qkv[base:base + SEQ_PAD,
                         2 * HIDDEN_D + lo:2 * HIDDEN_D + lo + D_HEAD]

                s = jax.lax.dot_general(
                    qh, kh, (((1,), (1,)), ((), ())),
                    preferred_element_type=jnp.float32) * inv_sqrt_dh   # (24, 24)
                s = s + key_mask
                s = s - jnp.max(s, axis=-1, keepdims=True)
                e = jnp.exp(s)
                attn = e * pl.reciprocal(jnp.sum(e, axis=-1, keepdims=True),
                                         approx=True)
                head_outs.append(jnp.dot(attn, vh,
                                         preferred_element_type=jnp.float32))
            img_outs.append(jnp.concatenate(head_outs, axis=-1))        # (24, 32)

        # residual add, register-resident (no VMEM round trip)
        x = x + jnp.concatenate(img_outs, axis=0)                       # (48, 32)

    # batched classifier head on both class tokens (rows 0 and SEQ_PAD)
    cls = jnp.concatenate([x[0:1, :], x[SEQ_PAD:SEQ_PAD + 1, :]], axis=0)  # (2, 32)
    w_mlp = params_ref[R_WMLP:R_WMLP + HIDDEN_D, :]                      # (32, 128)
    b_mlp = params_ref[R_BMLP:R_BMLP + 1, :]                             # (1, 128)
    logits = jnp.dot(cls, w_mlp, preferred_element_type=jnp.float32) + b_mlp
    logits = logits - jnp.max(logits, axis=-1, keepdims=True)
    e = jnp.exp(logits)                                                  # pad lanes -> 0
    out_ref[...] = e / jnp.sum(e, axis=-1, keepdims=True)                # dense (2,128) store


# ------------------------------ wrapper --------------------------------------
def patchify(images):
    """(N, C, H, W) -> (N, P*P, C*ps*ps), flatten order (c, ph, pw) per patch."""
    n = images.shape[0]
    x = images.reshape(n, C, N_PATCHES, PATCH_SIZE, N_PATCHES, PATCH_SIZE)
    x = x.transpose(0, 2, 4, 1, 3, 5)          # (n, i, j, c, ph, pw)
    return x.reshape(n, N_PP, INPUT_D)


def build_patch_seq(images):
    """(N,C,H,W) -> (N*SEQ_PAD, INPUT_D); cls row / pad rows per image are zero."""
    patches = patchify(images).astype(jnp.float32)           # (N, 16, INPUT_D)
    seq = jnp.zeros((N_BATCH, SEQ_PAD, INPUT_D), jnp.float32)
    seq = seq.at[:, 1:SEQ_LEN, :].set(patches)
    return seq.reshape(N_BATCH * SEQ_PAD, INPUT_D)


def pack_params(params):
    """Fold every parameter into one (P_ROWS, 128) f32 slab (single input DMA)."""
    (wmap, bmap, cls_tok, pos, lng, lnb,
     wq, bq, wk, bk, wv, bv, wmlp, bmlp) = [np.asarray(p, np.float32) for p in params]

    slab = np.zeros((P_ROWS, OUT_PAD), np.float32)

    # mapper weights
    slab[R_WMAP:R_WMAP + INPUT_D, :HIDDEN_D] = wmap

    # additive slab: row 0 = cls + pos[0], rows 1..16 = bmap + pos[i], pads 0
    add_one = np.zeros((SEQ_PAD, HIDDEN_D), np.float32)
    add_one[0] = cls_tok[0] + pos[0]
    add_one[1:SEQ_LEN] = bmap[0] + pos[1:SEQ_LEN]
    slab[R_ADD:R_ADD + N_BATCH * SEQ_PAD, :HIDDEN_D] = np.tile(add_one, (N_BATCH, 1))

    # per-block LN params, fused QKV bias & weights
    for blk in range(N_BLOCKS):
        r = R_SCAL + 8 * blk
        slab[r + 0, :HIDDEN_D] = lng[blk]
        slab[r + 1, :HIDDEN_D] = lnb[blk]
        slab[r + 2, :3 * HIDDEN_D] = np.concatenate([bq[blk], bk[blk], bv[blk]])
        slab[R_WQKV + blk * HIDDEN_D:R_WQKV + (blk + 1) * HIDDEN_D, :3 * HIDDEN_D] = \
            np.concatenate([wq[blk], wk[blk], wv[blk]], axis=-1)

    # classifier head; bias row masks pad lanes with -1e30 (exp underflows to 0)
    slab[R_WMLP:R_WMLP + HIDDEN_D, :OUT_D] = wmlp
    slab[R_BMLP, :] = -1e30
    slab[R_BMLP, :OUT_D] = bmlp[0]
    return jnp.asarray(slab)


def vit_forward(images, params):
    assert images.shape[0] == N_BATCH
    patches_seq = build_patch_seq(images)
    params_slab = pack_params(params)

    out = pl.pallas_call(
        vit_kernel,
        out_shape=jax.ShapeDtypeStruct((N_BATCH, OUT_PAD), jnp.float32),
        grid_spec=pltpu.PrefetchScalarGridSpec(
            num_scalar_prefetch=0,
            grid=(1,),
            in_specs=[
                pl.BlockSpec((N_BATCH * SEQ_PAD, INPUT_D), lambda i: (0, 0)),
                pl.BlockSpec((P_ROWS, OUT_PAD), lambda i: (0, 0)),
            ],
            out_specs=pl.BlockSpec((N_BATCH, OUT_PAD), lambda i: (0, 0)),
        ),
        compiler_params=pltpu.CompilerParams(
            dimension_semantics=("arbitrary",)),
    )(patches_seq, params_slab)
    return out[:, :OUT_D]


# ------------------------- deterministic params -------------------------------
def init_linear(key, fan_in, fan_out):
    """PyTorch nn.Linear default init (uniform +-1/sqrt(fan_in)); (in, out) layout."""
    k1, k2 = jax.random.split(key)
    bound = 1.0 / np.sqrt(fan_in)
    w = jax.random.uniform(k1, (fan_in, fan_out), jnp.float32, -bound, bound)
    b = jax.random.uniform(k2, (fan_out,), jnp.float32, -bound, bound)
    return w, b


def get_positional_embeddings(seq_len, d):
    res = np.ones((seq_len, d), dtype=np.float32)
    for i in range(seq_len):
        for j in range(d):
            if j % 2 == 0:
                res[i, j] = np.sin(i / 10000 ** (j / d))
            else:
                res[i, j] = np.cos(i / 10000 ** ((j - 1) / d))
    return jnp.asarray(res)


def init_params(key):
    keys = jax.random.split(key, 4 + N_BLOCKS * N_HEADS * 3)
    ki = iter(keys)

    wmap, bmap = init_linear(next(ki), INPUT_D, HIDDEN_D)
    bmap = bmap.reshape(1, HIDDEN_D)
    cls_tok = jax.random.uniform(next(ki), (1, HIDDEN_D), jnp.float32)  # torch.rand
    pos = get_positional_embeddings(SEQ_LEN, HIDDEN_D)

    lng = jnp.ones((N_BLOCKS, HIDDEN_D), jnp.float32)     # LayerNorm weight
    lnb = jnp.zeros((N_BLOCKS, HIDDEN_D), jnp.float32)    # LayerNorm bias

    def make_blockdiag():
        # per-head Linear(d_head, d_head) maps == block-diagonal (d, d) matrix
        W = jnp.zeros((HIDDEN_D, HIDDEN_D), jnp.float32)
        b = jnp.zeros((HIDDEN_D,), jnp.float32)
        for h in range(N_HEADS):
            wh, bh = init_linear(next(ki), D_HEAD, D_HEAD)
            lo, hi = h * D_HEAD, (h + 1) * D_HEAD
            W = W.at[lo:hi, lo:hi].set(wh)
            b = b.at[lo:hi].set(bh)
        return W, b

    wq_l, bq_l, wk_l, bk_l, wv_l, bv_l = [], [], [], [], [], []
    for _ in range(N_BLOCKS):
        W, b = make_blockdiag(); wq_l.append(W); bq_l.append(b)
        W, b = make_blockdiag(); wk_l.append(W); bk_l.append(b)
        W, b = make_blockdiag(); wv_l.append(W); bv_l.append(b)
    wq, bq = jnp.stack(wq_l), jnp.stack(bq_l)
    wk, bk = jnp.stack(wk_l), jnp.stack(bk_l)
    wv, bv = jnp.stack(wv_l), jnp.stack(bv_l)

    wmlp, bmlp = init_linear(next(ki), HIDDEN_D, OUT_D)
    bmlp = bmlp.reshape(1, OUT_D)

    return (wmap, bmap, cls_tok, pos, lng, lnb,
            wq, bq, wk, bk, wv, bv, wmlp, bmlp)


# ------------------------- pure-JAX reference (check) -------------------------
def vit_reference(images, params):
    (wmap, bmap, cls_tok, pos, lng, lnb,
     wq, bq, wk, bk, wv, bv, wmlp, bmlp) = params
    n = images.shape[0]
    patches = patchify(images).astype(jnp.float32)
    tokens = patches @ wmap + bmap                                  # (n, P², D)
    cls = jnp.broadcast_to(cls_tok[None], (n, 1, HIDDEN_D))
    x = jnp.concatenate([cls, tokens], axis=1) + pos[None]
    for b in range(N_BLOCKS):
        mean = jnp.mean(x, axis=-1, keepdims=True)
        var = jnp.mean((x - mean) ** 2, axis=-1, keepdims=True)
        xn = (x - mean) / jnp.sqrt(var + LN_EPS) * lng[b] + lnb[b]
        q = xn @ wq[b] + bq[b]
        k = xn @ wk[b] + bk[b]
        v = xn @ wv[b] + bv[b]
        outs = []
        for h in range(N_HEADS):
            lo, hi = h * D_HEAD, (h + 1) * D_HEAD
            s = jnp.einsum('nqd,nkd->nqk', q[..., lo:hi], k[..., lo:hi]) / (D_HEAD ** 0.5)
            a = jax.nn.softmax(s, axis=-1)
            outs.append(jnp.einsum('nqk,nkd->nqd', a, v[..., lo:hi]))
        x = x + jnp.concatenate(outs, axis=-1)
    logits = x[:, 0] @ wmlp + bmlp
    return jax.nn.softmax(logits, axis=-1)


# --------------------------------- main ---------------------------------------
if __name__ == "__main__":
    key = jax.random.PRNGKey(0)
    k_img, k_par = jax.random.split(key)

    images = jax.random.normal(k_img, (N_BATCH, C, H, W), jnp.float32)
    params = init_params(k_par)

    out = vit_forward(images, params)
    out = jax.block_until_ready(out)

    ref = vit_reference(images, params)
    # tolerance slightly looser than exact-f32 because the attention softmax
    # denominator uses the approx (EUP) reciprocal inside the kernel.
    np.testing.assert_allclose(np.asarray(out), np.asarray(ref),
                               rtol=2e-3, atol=5e-4)
    assert out.shape == (N_BATCH, OUT_D)

    print("KERNEL_OK")
</pallas_src>

<mosaic_0001>
module attributes {stable_mosaic.version = 11 : i64} {
  func.func @vit_kernel(%arg0: i32, %arg1: memref<48x64xf32, #tpu.memory_space<vmem>>, %arg2: memref<232x128xf32, #tpu.memory_space<vmem>>, %arg3: memref<2x128xf32, #tpu.memory_space<vmem>>) attributes {dimension_semantics = [#tpu.dimension_semantics<arbitrary>], iteration_bounds = array<i64: 1>, scalar_prefetch = 0 : i64, scratch_operands = 0 : i64, tpu.core_type = #tpu.core_type<tc>, window_params = [{pipeline_mode = #tpu.pipeline_mode<synchronous>, transform_indices = @transform_0, window_bounds = array<i64: 48, 64>}, {pipeline_mode = #tpu.pipeline_mode<synchronous>, transform_indices = @transform_1, window_bounds = array<i64: 232, 128>}, {pipeline_mode = #tpu.pipeline_mode<synchronous>, transform_indices = @transform_2, window_bounds = array<i64: 2, 128>}]} {
    %c0 = arith.constant 0 : index
    %c0_0 = arith.constant 0 : index
    %0 = vector.load %arg2[%c0, %c0_0] : memref<232x128xf32, #tpu.memory_space<vmem>>, vector<64x32xf32>
    %c64 = arith.constant 64 : index
    %c0_1 = arith.constant 0 : index
    %1 = vector.load %arg2[%c64, %c0_1] : memref<232x128xf32, #tpu.memory_space<vmem>>, vector<48x32xf32>
    %c0_2 = arith.constant 0 : index
    %c0_3 = arith.constant 0 : index
    %2 = vector.load %arg1[%c0_2, %c0_3] : memref<48x64xf32, #tpu.memory_space<vmem>>, vector<48x64xf32>
    %cst = arith.constant dense<0.000000e+00> : vector<48x32xf32>
    %3 = tpu.matmul %2, %0, %cst {dimension_numbers = #tpu.dot_dimension_numbers<[1], [0], [0], [1], [0, 0, 1, 1], [], []>} : vector<48x64xf32>, vector<64x32xf32>, vector<48x32xf32> -> vector<48x32xf32>
    %4 = arith.addf %3, %1 : vector<48x32xf32>
    %5 = tpu.iota {dimensions = array<i32: 1>} : vector<1x24xi32>
    %c17_i32 = arith.constant 17 : i32
    %6 = vector.broadcast %c17_i32 : i32 to vector<1x24xi32>
    %7 = arith.cmpi slt, %5, %6 : vector<1x24xi32>
    %cst_4 = arith.constant 0.000000e+00 : f32
    %cst_5 = arith.constant -1.000000e+30 : f32
    %8 = vector.broadcast %cst_4 : f32 to vector<1x24xf32>
    %9 = vector.broadcast %cst_5 : f32 to vector<1x24xf32>
    %10 = arith.select %7, %8, %9 : vector<1x24xi1>, vector<1x24xf32>
    %c112 = arith.constant 112 : index
    %c0_6 = arith.constant 0 : index
    %11 = vector.load %arg2[%c112, %c0_6] : memref<232x128xf32, #tpu.memory_space<vmem>>, vector<8x128xf32>
    %12 = vector.extract_strided_slice %11 {offsets = [0, 0], sizes = [1, 32], strides = [1, 1]} : vector<8x128xf32> to vector<1x32xf32>
    %13 = vector.extract_strided_slice %11 {offsets = [1, 0], sizes = [1, 32], strides = [1, 1]} : vector<8x128xf32> to vector<1x32xf32>
    %14 = vector.extract_strided_slice %11 {offsets = [2, 0], sizes = [1, 96], strides = [1, 1]} : vector<8x128xf32> to vector<1x96xf32>
    %c128 = arith.constant 128 : index
    %c0_7 = arith.constant 0 : index
    %15 = vector.load %arg2[%c128, %c0_7] : memref<232x128xf32, #tpu.memory_space<vmem>>, vector<32x96xf32>
    %cst_8 = arith.constant dense<0.000000e+00> : vector<48xf32>
    %16 = vector.multi_reduction <add>, %4, %cst_8 [1] : vector<48x32xf32> to vector<48xf32>
    %17 = vector.shape_cast %16 : vector<48xf32> to vector<48x1xf32>
    %cst_9 = arith.constant 3.200000e+01 : f32
    %18 = vector.broadcast %cst_9 : f32 to vector<48x1xf32>
    %19 = arith.divf %17, %18 : vector<48x1xf32>
    %20 = arith.mulf %4, %4 : vector<48x32xf32>
    %cst_10 = arith.constant dense<0.000000e+00> : vector<48xf32>
    %21 = vector.multi_reduction <add>, %20, %cst_10 [1] : vector<48x32xf32> to vector<48xf32>
    %22 = vector.shape_cast %21 : vector<48xf32> to vector<48x1xf32>
    %cst_11 = arith.constant 3.200000e+01 : f32
    %23 = vector.broadcast %cst_11 : f32 to vector<48x1xf32>
    %24 = arith.divf %22, %23 : vector<48x1xf32>
    %25 = arith.mulf %19, %19 : vector<48x1xf32>
    %26 = arith.subf %24, %25 : vector<48x1xf32>
    %27 = vector.broadcast %19 : vector<48x1xf32> to vector<48x32xf32>
    %28 = arith.subf %4, %27 : vector<48x32xf32>
    %cst_12 = arith.constant 9.99999974E-6 : f32
    %29 = vector.broadcast %cst_12 : f32 to vector<48x1xf32>
    %30 = arith.addf %26, %29 : vector<48x1xf32>
    %31 = math.rsqrt %30 : vector<48x1xf32>
    %32 = vector.broadcast %31 : vector<48x1xf32> to vector<48x32xf32>
    %33 = arith.mulf %28, %32 : vector<48x32xf32>
    %34 = vector.broadcast %12 : vector<1x32xf32> to vector<48x32xf32>
    %35 = arith.mulf %33, %34 : vector<48x32xf32>
    %36 = vector.broadcast %13 : vector<1x32xf32> to vector<48x32xf32>
    %37 = arith.addf %35, %36 : vector<48x32xf32>
    %cst_13 = arith.constant dense<0.000000e+00> : vector<48x96xf32>
    %38 = tpu.matmul %37, %15, %cst_13 {dimension_numbers = #tpu.dot_dimension_numbers<[1], [0], [0], [1], [0, 0, 1, 1], [], []>} : vector<48x32xf32>, vector<32x96xf32>, vector<48x96xf32> -> vector<48x96xf32>
    %39 = vector.broadcast %14 : vector<1x96xf32> to vector<48x96xf32>
    %40 = arith.addf %38, %39 : vector<48x96xf32>
    %41 = vector.extract_strided_slice %40 {offsets = [0, 0], sizes = [24, 16], strides = [1, 1]} : vector<48x96xf32> to vector<24x16xf32>
    %42 = vector.extract_strided_slice %40 {offsets = [0, 32], sizes = [24, 16], strides = [1, 1]} : vector<48x96xf32> to vector<24x16xf32>
    %43 = vector.extract_strided_slice %40 {offsets = [0, 64], sizes = [24, 16], strides = [1, 1]} : vector<48x96xf32> to vector<24x16xf32>
    %cst_14 = arith.constant dense<0.000000e+00> : vector<24x24xf32>
    %44 = tpu.matmul %41, %42, %cst_14 {dimension_numbers = #tpu.dot_dimension_numbers<[1], [1], [0], [0], [0, 0, 1, 0], [], []>} : vector<24x16xf32>, vector<24x16xf32>, vector<24x24xf32> -> vector<24x24xf32>
    %cst_15 = arith.constant 2.500000e-01 : f32
    %45 = vector.broadcast %cst_15 : f32 to vector<24x24xf32>
    %46 = arith.mulf %44, %45 : vector<24x24xf32>
    %47 = vector.broadcast %10 : vector<1x24xf32> to vector<24x24xf32>
    %48 = arith.addf %46, %47 : vector<24x24xf32>
    %cst_16 = arith.constant dense<0xFF800000> : vector<24xf32>
    %49 = vector.multi_reduction <maximumf>, %48, %cst_16 [1] : vector<24x24xf32> to vector<24xf32>
    %50 = vector.shape_cast %49 : vector<24xf32> to vector<24x1xf32>
    %51 = vector.broadcast %50 : vector<24x1xf32> to vector<24x24xf32>
    %52 = arith.subf %48, %51 : vector<24x24xf32>
    %53 = math.exp %52 : vector<24x24xf32>
    %cst_17 = arith.constant dense<0.000000e+00> : vector<24xf32>
    %54 = vector.multi_reduction <add>, %53, %cst_17 [1] : vector<24x24xf32> to vector<24xf32>
    %55 = vector.shape_cast %54 : vector<24xf32> to vector<24x1xf32>
    %56 = tpu.reciprocal %55 {approx = true} : vector<24x1xf32> -> vector<24x1xf32>
    %57 = vector.broadcast %56 : vector<24x1xf32> to vector<24x24xf32>
    %58 = arith.mulf %53, %57 : vector<24x24xf32>
    %cst_18 = arith.constant dense<0.000000e+00> : vector<24x16xf32>
    %59 = tpu.matmul %58, %43, %cst_18 {dimension_numbers = #tpu.dot_dimension_numbers<[1], [0], [0], [1], [0, 0, 1, 1], [], []>} : vector<24x24xf32>, vector<24x16xf32>, vector<24x16xf32> -> vector<24x16xf32>
    %60 = vector.extract_strided_slice %40 {offsets = [0, 16], sizes = [24, 16], strides = [1, 1]} : vector<48x96xf32> to vector<24x16xf32>
    %61 = vector.extract_strided_slice %40 {offsets = [0, 48], sizes = [24, 16], strides = [1, 1]} : vector<48x96xf32> to vector<24x16xf32>
    %62 = vector.extract_strided_slice %40 {offsets = [0, 80], sizes = [24, 16], strides = [1, 1]} : vector<48x96xf32> to vector<24x16xf32>
    %cst_19 = arith.constant dense<0.000000e+00> : vector<24x24xf32>
    %63 = tpu.matmul %60, %61, %cst_19 {dimension_numbers = #tpu.dot_dimension_numbers<[1], [1], [0], [0], [0, 0, 1, 0], [], []>} : vector<24x16xf32>, vector<24x16xf32>, vector<24x24xf32> -> vector<24x24xf32>
    %cst_20 = arith.constant 2.500000e-01 : f32
    %64 = vector.broadcast %cst_20 : f32 to vector<24x24xf32>
    %65 = arith.mulf %63, %64 : vector<24x24xf32>
    %66 = vector.broadcast %10 : vector<1x24xf32> to vector<24x24xf32>
    %67 = arith.addf %65, %66 : vector<24x24xf32>
    %cst_21 = arith.constant dense<0xFF800000> : vector<24xf32>
    %68 = vector.multi_reduction <maximumf>, %67, %cst_21 [1] : vector<24x24xf32> to vector<24xf32>
    %69 = vector.shape_cast %68 : vector<24xf32> to vector<24x1xf32>
    %70 = vector.broadcast %69 : vector<24x1xf32> to vector<24x24xf32>
    %71 = arith.subf %67, %70 : vector<24x24xf32>
    %72 = math.exp %71 : vector<24x24xf32>
    %cst_22 = arith.constant dense<0.000000e+00> : vector<24xf32>
    %73 = vector.multi_reduction <add>, %72, %cst_22 [1] : vector<24x24xf32> to vector<24xf32>
    %74 = vector.shape_cast %73 : vector<24xf32> to vector<24x1xf32>
    %75 = tpu.reciprocal %74 {approx = true} : vector<24x1xf32> -> vector<24x1xf32>
    %76 = vector.broadcast %75 : vector<24x1xf32> to vector<24x24xf32>
    %77 = arith.mulf %72, %76 : vector<24x24xf32>
    %cst_23 = arith.constant dense<0.000000e+00> : vector<24x16xf32>
    %78 = tpu.matmul %77, %62, %cst_23 {dimension_numbers = #tpu.dot_dimension_numbers<[1], [0], [0], [1], [0, 0, 1, 1], [], []>} : vector<24x24xf32>, vector<24x16xf32>, vector<24x16xf32> -> vector<24x16xf32>
    %79 = tpu.concatenate %59, %78 in 1 : vector<24x16xf32>, vector<24x16xf32> -> vector<24x32xf32>
    %80 = vector.extract_strided_slice %40 {offsets = [24, 0], sizes = [24, 16], strides = [1, 1]} : vector<48x96xf32> to vector<24x16xf32>
    %81 = vector.extract_strided_slice %40 {offsets = [24, 32], sizes = [24, 16], strides = [1, 1]} : vector<48x96xf32> to vector<24x16xf32>
    %82 = vector.extract_strided_slice %40 {offsets = [24, 64], sizes = [24, 16], strides = [1, 1]} : vector<48x96xf32> to vector<24x16xf32>
    %cst_24 = arith.constant dense<0.000000e+00> : vector<24x24xf32>
    %83 = tpu.matmul %80, %81, %cst_24 {dimension_numbers = #tpu.dot_dimension_numbers<[1], [1], [0], [0], [0, 0, 1, 0], [], []>} : vector<24x16xf32>, vector<24x16xf32>, vector<24x24xf32> -> vector<24x24xf32>
    %cst_25 = arith.constant 2.500000e-01 : f32
    %84 = vector.broadcast %cst_25 : f32 to vector<24x24xf32>
    %85 = arith.mulf %83, %84 : vector<24x24xf32>
    %86 = vector.broadcast %10 : vector<1x24xf32> to vector<24x24xf32>
    %87 = arith.addf %85, %86 : vector<24x24xf32>
    %cst_26 = arith.constant dense<0xFF800000> : vector<24xf32>
    %88 = vector.multi_reduction <maximumf>, %87, %cst_26 [1] : vector<24x24xf32> to vector<24xf32>
    %89 = vector.shape_cast %88 : vector<24xf32> to vector<24x1xf32>
    %90 = vector.broadcast %89 : vector<24x1xf32> to vector<24x24xf32>
    %91 = arith.subf %87, %90 : vector<24x24xf32>
    %92 = math.exp %91 : vector<24x24xf32>
    %cst_27 = arith.constant dense<0.000000e+00> : vector<24xf32>
    %93 = vector.multi_reduction <add>, %92, %cst_27 [1] : vector<24x24xf32> to vector<24xf32>
    %94 = vector.shape_cast %93 : vector<24xf32> to vector<24x1xf32>
    %95 = tpu.reciprocal %94 {approx = true} : vector<24x1xf32> -> vector<24x1xf32>
    %96 = vector.broadcast %95 : vector<24x1xf32> to vector<24x24xf32>
    %97 = arith.mulf %92, %96 : vector<24x24xf32>
    %cst_28 = arith.constant dense<0.000000e+00> : vector<24x16xf32>
    %98 = tpu.matmul %97, %82, %cst_28 {dimension_numbers = #tpu.dot_dimension_numbers<[1], [0], [0], [1], [0, 0, 1, 1], [], []>} : vector<24x24xf32>, vector<24x16xf32>, vector<24x16xf32> -> vector<24x16xf32>
    %99 = vector.extract_strided_slice %40 {offsets = [24, 16], sizes = [24, 16], strides = [1, 1]} : vector<48x96xf32> to vector<24x16xf32>
    %100 = vector.extract_strided_slice %40 {offsets = [24, 48], sizes = [24, 16], strides = [1, 1]} : vector<48x96xf32> to vector<24x16xf32>
    %101 = vector.extract_strided_slice %40 {offsets = [24, 80], sizes = [24, 16], strides = [1, 1]} : vector<48x96xf32> to vector<24x16xf32>
    %cst_29 = arith.constant dense<0.000000e+00> : vector<24x24xf32>
    %102 = tpu.matmul %99, %100, %cst_29 {dimension_numbers = #tpu.dot_dimension_numbers<[1], [1], [0], [0], [0, 0, 1, 0], [], []>} : vector<24x16xf32>, vector<24x16xf32>, vector<24x24xf32> -> vector<24x24xf32>
    %cst_30 = arith.constant 2.500000e-01 : f32
    %103 = vector.broadcast %cst_30 : f32 to vector<24x24xf32>
    %104 = arith.mulf %102, %103 : vector<24x24xf32>
    %105 = vector.broadcast %10 : vector<1x24xf32> to vector<24x24xf32>
    %106 = arith.addf %104, %105 : vector<24x24xf32>
    %cst_31 = arith.constant dense<0xFF800000> : vector<24xf32>
    %107 = vector.multi_reduction <maximumf>, %106, %cst_31 [1] : vector<24x24xf32> to vector<24xf32>
    %108 = vector.shape_cast %107 : vector<24xf32> to vector<24x1xf32>
    %109 = vector.broadcast %108 : vector<24x1xf32> to vector<24x24xf32>
    %110 = arith.subf %106, %109 : vector<24x24xf32>
    %111 = math.exp %110 : vector<24x24xf32>
    %cst_32 = arith.constant dense<0.000000e+00> : vector<24xf32>
    %112 = vector.multi_reduction <add>, %111, %cst_32 [1] : vector<24x24xf32> to vector<24xf32>
    %113 = vector.shape_cast %112 : vector<24xf32> to vector<24x1xf32>
    %114 = tpu.reciprocal %113 {approx = true} : vector<24x1xf32> -> vector<24x1xf32>
    %115 = vector.broadcast %114 : vector<24x1xf32> to vector<24x24xf32>
    %116 = arith.mulf %111, %115 : vector<24x24xf32>
    %cst_33 = arith.constant dense<0.000000e+00> : vector<24x16xf32>
    %117 = tpu.matmul %116, %101, %cst_33 {dimension_numbers = #tpu.dot_dimension_numbers<[1], [0], [0], [1], [0, 0, 1, 1], [], []>} : vector<24x24xf32>, vector<24x16xf32>, vector<24x16xf32> -> vector<24x16xf32>
    %118 = tpu.concatenate %98, %117 in 1 : vector<24x16xf32>, vector<24x16xf32> -> vector<24x32xf32>
    %119 = tpu.concatenate %79, %118 in 0 : vector<24x32xf32>, vector<24x32xf32> -> vector<48x32xf32>
    %120 = arith.addf %4, %119 : vector<48x32xf32>
    %c120 = arith.constant 120 : index
    %c0_34 = arith.constant 0 : index
    %121 = vector.load %arg2[%c120, %c0_34] : memref<232x128xf32, #tpu.memory_space<vmem>>, vector<8x128xf32>
    %122 = vector.extract_strided_slice %121 {offsets = [0, 0], sizes = [1, 32], strides = [1, 1]} : vector<8x128xf32> to vector<1x32xf32>
    %123 = vector.extract_strided_slice %121 {offsets = [1, 0], sizes = [1, 32], strides = [1, 1]} : vector<8x128xf32> to vector<1x32xf32>
    %124 = vector.extract_strided_slice %121 {offsets = [2, 0], sizes = [1, 96], strides = [1, 1]} : vector<8x128xf32> to vector<1x96xf32>
    %c160 = arith.constant 160 : index
    %c0_35 = arith.constant 0 : index
    %125 = vector.load %arg2[%c160, %c0_35] : memref<232x128xf32, #tpu.memory_space<vmem>>, vector<32x96xf32>
    %cst_36 = arith.constant dense<0.000000e+00> : vector<48xf32>
    %126 = vector.multi_reduction <add>, %120, %cst_36 [1] : vector<48x32xf32> to vector<48xf32>
    %127 = vector.shape_cast %126 : vector<48xf32> to vector<48x1xf32>
    %cst_37 = arith.constant 3.200000e+01 : f32
    %128 = vector.broadcast %cst_37 : f32 to vector<48x1xf32>
    %129 = arith.divf %127, %128 : vector<48x1xf32>
    %130 = arith.mulf %120, %120 : vector<48x32xf32>
    %cst_38 = arith.constant dense<0.000000e+00> : vector<48xf32>
    %131 = vector.multi_reduction <add>, %130, %cst_38 [1] : vector<48x32xf32> to vector<48xf32>
    %132 = vector.shape_cast %131 : vector<48xf32> to vector<48x1xf32>
    %cst_39 = arith.constant 3.200000e+01 : f32
    %133 = vector.broadcast %cst_39 : f32 to vector<48x1xf32>
    %134 = arith.divf %132, %133 : vector<48x1xf32>
    %135 = arith.mulf %129, %129 : vector<48x1xf32>
    %136 = arith.subf %134, %135 : vector<48x1xf32>
    %137 = vector.broadcast %129 : vector<48x1xf32> to vector<48x32xf32>
    %138 = arith.subf %120, %137 : vector<48x32xf32>
    %cst_40 = arith.constant 9.99999974E-6 : f32
    %139 = vector.broadcast %cst_40 : f32 to vector<48x1xf32>
    %140 = arith.addf %136, %139 : vector<48x1xf32>
    %141 = math.rsqrt %140 : vector<48x1xf32>
    %142 = vector.broadcast %141 : vector<48x1xf32> to vector<48x32xf32>
    %143 = arith.mulf %138, %142 : vector<48x32xf32>
    %144 = vector.broadcast %122 : vector<1x32xf32> to vector<48x32xf32>
    %145 = arith.mulf %143, %144 : vector<48x32xf32>
    %146 = vector.broadcast %123 : vector<1x32xf32> to vector<48x32xf32>
    %147 = arith.addf %145, %146 : vector<48x32xf32>
    %cst_41 = arith.constant dense<0.000000e+00> : vector<48x96xf32>
    %148 = tpu.matmul %147, %125, %cst_41 {dimension_numbers = #tpu.dot_dimension_numbers<[1], [0], [0], [1], [0, 0, 1, 1], [], []>} : vector<48x32xf32>, vector<32x96xf32>, vector<48x96xf32> -> vector<48x96xf32>
    %149 = vector.broadcast %124 : vector<1x96xf32> to vector<48x96xf32>
    %150 = arith.addf %148, %149 : vector<48x96xf32>
    %151 = vector.extract_strided_slice %150 {offsets = [0, 0], sizes = [24, 16], strides = [1, 1]} : vector<48x96xf32> to vector<24x16xf32>
    %152 = vector.extract_strided_slice %150 {offsets = [0, 32], sizes = [24, 16], strides = [1, 1]} : vector<48x96xf32> to vector<24x16xf32>
    %153 = vector.extract_strided_slice %150 {offsets = [0, 64], sizes = [24, 16], strides = [1, 1]} : vector<48x96xf32> to vector<24x16xf32>
    %cst_42 = arith.constant dense<0.000000e+00> : vector<24x24xf32>
    %154 = tpu.matmul %151, %152, %cst_42 {dimension_numbers = #tpu.dot_dimension_numbers<[1], [1], [0], [0], [0, 0, 1, 0], [], []>} : vector<24x16xf32>, vector<24x16xf32>, vector<24x24xf32> -> vector<24x24xf32>
    %cst_43 = arith.constant 2.500000e-01 : f32
    %155 = vector.broadcast %cst_43 : f32 to vector<24x24xf32>
    %156 = arith.mulf %154, %155 : vector<24x24xf32>
    %157 = vector.broadcast %10 : vector<1x24xf32> to vector<24x24xf32>
    %158 = arith.addf %156, %157 : vector<24x24xf32>
    %cst_44 = arith.constant dense<0xFF800000> : vector<24xf32>
    %159 = vector.multi_reduction <maximumf>, %158, %cst_44 [1] : vector<24x24xf32> to vector<24xf32>
    %160 = vector.shape_cast %159 : vector<24xf32> to vector<24x1xf32>
    %161 = vector.broadcast %160 : vector<24x1xf32> to vector<24x24xf32>
    %162 = arith.subf %158, %161 : vector<24x24xf32>
    %163 = math.exp %162 : vector<24x24xf32>
    %cst_45 = arith.constant dense<0.000000e+00> : vector<24xf32>
    %164 = vector.multi_reduction <add>, %163, %cst_45 [1] : vector<24x24xf32> to vector<24xf32>
    %165 = vector.shape_cast %164 : vector<24xf32> to vector<24x1xf32>
    %166 = tpu.reciprocal %165 {approx = true} : vector<24x1xf32> -> vector<24x1xf32>
    %167 = vector.broadcast %166 : vector<24x1xf32> to vector<24x24xf32>
    %168 = arith.mulf %163, %167 : vector<24x24xf32>
    %cst_46 = arith.constant dense<0.000000e+00> : vector<24x16xf32>
    %169 = tpu.matmul %168, %153, %cst_46 {dimension_numbers = #tpu.dot_dimension_numbers<[1], [0], [0], [1], [0, 0, 1, 1], [], []>} : vector<24x24xf32>, vector<24x16xf32>, vector<24x16xf32> -> vector<24x16xf32>
    %170 = vector.extract_strided_slice %150 {offsets = [0, 16], sizes = [24, 16], strides = [1, 1]} : vector<48x96xf32> to vector<24x16xf32>
    %171 = vector.extract_strided_slice %150 {offsets = [0, 48], sizes = [24, 16], strides = [1, 1]} : vector<48x96xf32> to vector<24x16xf32>
    %172 = vector.extract_strided_slice %150 {offsets = [0, 80], sizes = [24, 16], strides = [1, 1]} : vector<48x96xf32> to vector<24x16xf32>
    %cst_47 = arith.constant dense<0.000000e+00> : vector<24x24xf32>
    %173 = tpu.matmul %170, %171, %cst_47 {dimension_numbers = #tpu.dot_dimension_numbers<[1], [1], [0], [0], [0, 0, 1, 0], [], []>} : vector<24x16xf32>, vector<24x16xf32>, vector<24x24xf32> -> vector<24x24xf32>
    %cst_48 = arith.constant 2.500000e-01 : f32
    %174 = vector.broadcast %cst_48 : f32 to vector<24x24xf32>
    %175 = arith.mulf %173, %174 : vector<24x24xf32>
    %176 = vector.broadcast %10 : vector<1x24xf32> to vector<24x24xf32>
    %177 = arith.addf %175, %176 : vector<24x24xf32>
    %cst_49 = arith.constant dense<0xFF800000> : vector<24xf32>
    %178 = vector.multi_reduction <maximumf>, %177, %cst_49 [1] : vector<24x24xf32> to vector<24xf32>
    %179 = vector.shape_cast %178 : vector<24xf32> to vector<24x1xf32>
    %180 = vector.broadcast %179 : vector<24x1xf32> to vector<24x24xf32>
    %181 = arith.subf %177, %180 : vector<24x24xf32>
    %182 = math.exp %181 : vector<24x24xf32>
    %cst_50 = arith.constant dense<0.000000e+00> : vector<24xf32>
    %183 = vector.multi_reduction <add>, %182, %cst_50 [1] : vector<24x24xf32> to vector<24xf32>
    %184 = vector.shape_cast %183 : vector<24xf32> to vector<24x1xf32>
    %185 = tpu.reciprocal %184 {approx = true} : vector<24x1xf32> -> vector<24x1xf32>
    %186 = vector.broadcast %185 : vector<24x1xf32> to vector<24x24xf32>
    %187 = arith.mulf %182, %186 : vector<24x24xf32>
    %cst_51 = arith.constant dense<0.000000e+00> : vector<24x16xf32>
    %188 = tpu.matmul %187, %172, %cst_51 {dimension_numbers = #tpu.dot_dimension_numbers<[1], [0], [0], [1], [0, 0, 1, 1], [], []>} : vector<24x24xf32>, vector<24x16xf32>, vector<24x16xf32> -> vector<24x16xf32>
    %189 = tpu.concatenate %169, %188 in 1 : vector<24x16xf32>, vector<24x16xf32> -> vector<24x32xf32>
    %190 = vector.extract_strided_slice %150 {offsets = [24, 0], sizes = [24, 16], strides = [1, 1]} : vector<48x96xf32> to vector<24x16xf32>
    %191 = vector.extract_strided_slice %150 {offsets = [24, 32], sizes = [24, 16], strides = [1, 1]} : vector<48x96xf32> to vector<24x16xf32>
    %192 = vector.extract_strided_slice %150 {offsets = [24, 64], sizes = [24, 16], strides = [1, 1]} : vector<48x96xf32> to vector<24x16xf32>
    %cst_52 = arith.constant dense<0.000000e+00> : vector<24x24xf32>
    %193 = tpu.matmul %190, %191, %cst_52 {dimension_numbers = #tpu.dot_dimension_numbers<[1], [1], [0], [0], [0, 0, 1, 0], [], []>} : vector<24x16xf32>, vector<24x16xf32>, vector<24x24xf32> -> vector<24x24xf32>
    %cst_53 = arith.constant 2.500000e-01 : f32
    %194 = vector.broadcast %cst_53 : f32 to vector<24x24xf32>
    %195 = arith.mulf %193, %194 : vector<24x24xf32>
    %196 = vector.broadcast %10 : vector<1x24xf32> to vector<24x24xf32>
    %197 = arith.addf %195, %196 : vector<24x24xf32>
    %cst_54 = arith.constant dense<0xFF800000> : vector<24xf32>
    %198 = vector.multi_reduction <maximumf>, %197, %cst_54 [1] : vector<24x24xf32> to vector<24xf32>
    %199 = vector.shape_cast %198 : vector<24xf32> to vector<24x1xf32>
    %200 = vector.broadcast %199 : vector<24x1xf32> to vector<24x24xf32>
    %201 = arith.subf %197, %200 : vector<24x24xf32>
    %202 = math.exp %201 : vector<24x24xf32>
    %cst_55 = arith.constant dense<0.000000e+00> : vector<24xf32>
    %203 = vector.multi_reduction <add>, %202, %cst_55 [1] : vector<24x24xf32> to vector<24xf32>
    %204 = vector.shape_cast %203 : vector<24xf32> to vector<24x1xf32>
    %205 = tpu.reciprocal %204 {approx = true} : vector<24x1xf32> -> vector<24x1xf32>
    %206 = vector.broadcast %205 : vector<24x1xf32> to vector<24x24xf32>
    %207 = arith.mulf %202, %206 : vector<24x24xf32>
    %cst_56 = arith.constant dense<0.000000e+00> : vector<24x16xf32>
    %208 = tpu.matmul %207, %192, %cst_56 {dimension_numbers = #tpu.dot_dimension_numbers<[1], [0], [0], [1], [0, 0, 1, 1], [], []>} : vector<24x24xf32>, vector<24x16xf32>, vector<24x16xf32> -> vector<24x16xf32>
    %209 = vector.extract_strided_slice %150 {offsets = [24, 16], sizes = [24, 16], strides = [1, 1]} : vector<48x96xf32> to vector<24x16xf32>
    %210 = vector.extract_strided_slice %150 {offsets = [24, 48], sizes = [24, 16], strides = [1, 1]} : vector<48x96xf32> to vector<24x16xf32>
    %211 = vector.extract_strided_slice %150 {offsets = [24, 80], sizes = [24, 16], strides = [1, 1]} : vector<48x96xf32> to vector<24x16xf32>
    %cst_57 = arith.constant dense<0.000000e+00> : vector<24x24xf32>
    %212 = tpu.matmul %209, %210, %cst_57 {dimension_numbers = #tpu.dot_dimension_numbers<[1], [1], [0], [0], [0, 0, 1, 0], [], []>} : vector<24x16xf32>, vector<24x16xf32>, vector<24x24xf32> -> vector<24x24xf32>
    %cst_58 = arith.constant 2.500000e-01 : f32
    %213 = vector.broadcast %cst_58 : f32 to vector<24x24xf32>
    %214 = arith.mulf %212, %213 : vector<24x24xf32>
    %215 = vector.broadcast %10 : vector<1x24xf32> to vector<24x24xf32>
    %216 = arith.addf %214, %215 : vector<24x24xf32>
    %cst_59 = arith.constant dense<0xFF800000> : vector<24xf32>
    %217 = vector.multi_reduction <maximumf>, %216, %cst_59 [1] : vector<24x24xf32> to vector<24xf32>
    %218 = vector.shape_cast %217 : vector<24xf32> to vector<24x1xf32>
    %219 = vector.broadcast %218 : vector<24x1xf32> to vector<24x24xf32>
    %220 = arith.subf %216, %219 : vector<24x24xf32>
    %221 = math.exp %220 : vector<24x24xf32>
    %cst_60 = arith.constant dense<0.000000e+00> : vector<24xf32>
    %222 = vector.multi_reduction <add>, %221, %cst_60 [1] : vector<24x24xf32> to vector<24xf32>
    %223 = vector.shape_cast %222 : vector<24xf32> to vector<24x1xf32>
    %224 = tpu.reciprocal %223 {approx = true} : vector<24x1xf32> -> vector<24x1xf32>
    %225 = vector.broadcast %224 : vector<24x1xf32> to vector<24x24xf32>
    %226 = arith.mulf %221, %225 : vector<24x24xf32>
    %cst_61 = arith.constant dense<0.000000e+00> : vector<24x16xf32>
    %227 = tpu.matmul %226, %211, %cst_61 {dimension_numbers = #tpu.dot_dimension_numbers<[1], [0], [0], [1], [0, 0, 1, 1], [], []>} : vector<24x24xf32>, vector<24x16xf32>, vector<24x16xf32> -> vector<24x16xf32>
    %228 = tpu.concatenate %208, %227 in 1 : vector<24x16xf32>, vector<24x16xf32> -> vector<24x32xf32>
    %229 = tpu.concatenate %189, %228 in 0 : vector<24x32xf32>, vector<24x32xf32> -> vector<48x32xf32>
    %230 = arith.addf %120, %229 : vector<48x32xf32>
    %231 = vector.extract_strided_slice %230 {offsets = [0, 0], sizes = [1, 32], strides = [1, 1]} : vector<48x32xf32> to vector<1x32xf32>
    %232 = vector.extract_strided_slice %230 {offsets = [24, 0], sizes = [1, 32], strides = [1, 1]} : vector<48x32xf32> to vector<1x32xf32>
    %233 = tpu.concatenate %231, %232 in 0 : vector<1x32xf32>, vector<1x32xf32> -> vector<2x32xf32>
    %c192 = arith.constant 192 : index
    %c0_62 = arith.constant 0 : index
    %234 = vector.load %arg2[%c192, %c0_62] : memref<232x128xf32, #tpu.memory_space<vmem>>, vector<32x128xf32>
    %c224 = arith.constant 224 : index
    %c0_63 = arith.constant 0 : index
    %235 = vector.load %arg2[%c224, %c0_63] : memref<232x128xf32, #tpu.memory_space<vmem>>, vector<1x128xf32>
    %cst_64 = arith.constant dense<0.000000e+00> : vector<2x128xf32>
    %236 = tpu.matmul %233, %234, %cst_64 {dimension_numbers = #tpu.dot_dimension_numbers<[1], [0], [0], [1], [0, 0, 1, 1], [], []>} : vector<2x32xf32>, vector<32x128xf32>, vector<2x128xf32> -> vector<2x128xf32>
    %237 = vector.broadcast %235 : vector<1x128xf32> to vector<2x128xf32>
    %238 = arith.addf %236, %237 : vector<2x128xf32>
    %cst_65 = arith.constant dense<0xFF800000> : vector<2xf32>
    %239 = vector.multi_reduction <maximumf>, %238, %cst_65 [1] : vector<2x128xf32> to vector<2xf32>
    %240 = vector.shape_cast %239 : vector<2xf32> to vector<2x1xf32>
    %241 = vector.broadcast %240 : vector<2x1xf32> to vector<2x128xf32>
    %242 = arith.subf %238, %241 : vector<2x128xf32>
    %243 = math.exp %242 : vector<2x128xf32>
    %cst_66 = arith.constant dense<0.000000e+00> : vector<2xf32>
    %244 = vector.multi_reduction <add>, %243, %cst_66 [1] : vector<2x128xf32> to vector<2xf32>
    %245 = vector.shape_cast %244 : vector<2xf32> to vector<2x1xf32>
    %246 = vector.broadcast %245 : vector<2x1xf32> to vector<2x128xf32>
    %247 = arith.divf %243, %246 : vector<2x128xf32>
    %c0_67 = arith.constant 0 : index
    %c0_68 = arith.constant 0 : index
    %248 = vector.load %arg3[%c0_67, %c0_68] : memref<2x128xf32, #tpu.memory_space<vmem>>, vector<2x128xf32>
    tpu.vector_store %arg3[%c0_67, %c0_68], %247 {strides = array<i32>} : memref<2x128xf32, #tpu.memory_space<vmem>>, vector<2x128xf32>,
    return
  }
  func.func @transform_0(%arg0: i32) -> (i32, i32) {
    %c0_i32 = arith.constant 0 : i32
    %c0_i32_0 = arith.constant 0 : i32
    %c0_i32_1 = arith.constant 0 : i32
    return %c0_i32, %c0_i32_0 : i32, i32
  }
  func.func @transform_1(%arg0: i32) -> (i32, i32) {
    %c0_i32 = arith.constant 0 : i32
    %c0_i32_0 = arith.constant 0 : i32
    %c0_i32_1 = arith.constant 0 : i32
    return %c0_i32, %c0_i32_0 : i32, i32
  }
  func.func @transform_2(%arg0: i32) -> (i32, i32) {
    %c0_i32 = arith.constant 0 : i32
    %c0_i32_0 = arith.constant 0 : i32
    %c0_i32_1 = arith.constant 0 : i32
    return %c0_i32, %c0_i32_0 : i32, i32
  }
}

</mosaic_0001>

<bundles_post_ra>
// kernel: tpu_custom_call.1
= control target key start
LH: loop header
LB: loop body
LE: loop exit
PB: predicated region body
PF: predicated region fallthrough
CT: control target
= control target key end

     0   :  { %7 = vsyncpa [#allocation3], 0  ;;  %s4452_s0 = inlined_call_operand.hbm [shape: f32[48,64], index: 0, kind: input, shape index: {}]   ;;  %s4453_s1 = inlined_call_operand.hbm [shape: f32[232,128], index: 1, kind: input, shape index: {}]   ;;  %s4454_s2 = inlined_call_operand.hbm [shape: f32[2,128], index: 2, kind: output, shape index: {}]  }
   0x1   :  { %8 = vsyncpa [#allocation6], 0 }
   0x2   :  { %9 = vsyncpa [#allocation4], 0  ;;  %s3640_s9 = smov [#allocation2]   ;;  %s3568_s13 = scalar_lea.hbm %s4452_s0, 768 }
   0x3   :  { %s15_s10 = sshll.u32 %s3640_s9, 4  ;;  %p3569_p0 = scmp.ne.s32.totalorder %s4452_s0, %s3568_s13  ;;  %s16_s10 = int_to_ptr.vmem [resolvable:$true] %s15_s10 }
   0x4   :  { %p3572_p1 = scmp.lt.u32.totalorder %s3568_s13, %s4452_s0 }
   0x6   :  { %p3574_p2 = pnand %p3572_p1, %p3569_p0 }
   0x8   :  { %3577 = shalt.err (!%p3574_p2)
}
   0x9   :  { %s3578_s18 = scalar_lea.vmem %s16_s10, 768  ;;  %p3583_p4 = scmp.lt.s32.totalorder %s16_s10, %s16_s10 }
   0xa   :  { %p3579_p3 = scmp.ne.s32.totalorder %s16_s10, %s3578_s18  ;;  %p3584_p5 = scmp.lt.s32.totalorder %s3578_s18, %s3578_s18 }
   0xc   :  { %p3585_p6 = por %p3584_p5, %p3583_p4 }
   0xe   :  { %p3586_p7 = pnand %p3585_p6, %p3579_p3 }
  0x10   :  { %3589 = shalt.err (!%p3586_p7)
}
  0x11   :  { %s3641_s19 = smov 128   ;;  %s3642_s20 = smov 8  }
  0x12   :  { %21 = dma.hbm_to_vmem [thread:$0]  %s4452_s0, 768, %s16_s10, [#allocation3], %s3641_s19, %s3641_s19, %s3642_s20  }
  0x13   :  { %s3643_s23 = smov [#allocation5]   ;;  %s3590_s27 = scalar_lea.hbm %s4453_s1, 3712 }
  0x14   :  { %s27_s24 = sshll.u32 %s3643_s23, 4  ;;  %p3591_p8 = scmp.ne.s32.totalorder %s4453_s1, %s3590_s27  ;;  %s28_s24 = int_to_ptr.vmem [resolvable:$true] %s27_s24 }
  0x15   :  { %p3594_p9 = scmp.lt.u32.totalorder %s3590_s27, %s4453_s1 }
  0x17   :  { %p3596_p10 = pnand %p3594_p9, %p3591_p8 }
  0x19   :  { %3599 = shalt.err (!%p3596_p10)
}
  0x1a   :  { %s3600_s4 = scalar_lea.vmem %s28_s24, 3712  ;;  %p3605_p12 = scmp.lt.s32.totalorder %s28_s24, %s28_s24 }
  0x1b   :  { %p3601_p11 = scmp.ne.s32.totalorder %s28_s24, %s3600_s4  ;;  %p3606_p13 = scmp.lt.s32.totalorder %s3600_s4, %s3600_s4 }
  0x1d   :  { %p3607_p0 = por %p3606_p13, %p3605_p12 }
  0x1f   :  { %p3608_p1 = pnand %p3607_p0, %p3601_p11 }
  0x21   :  { %3611 = shalt.err (!%p3608_p1)
}
  0x22   :  { %33 = dma.hbm_to_vmem [thread:$0]  %s4453_s1, 3712, %s28_s24, [#allocation6], %s3641_s19, %s3641_s19, %s3642_s20  }
  0x23   :  { %3634 = dma.done.wait [#allocation3], 768  }
  0x24   :  { %3635 = vsyncadd [#allocation3], 4294966528 }
  0x25   :  { %3636 = dma.done.wait [#allocation6], 3712  }
  0x26   :  { %3637 = vsyncadd [#allocation6], 4294963584  ;;  %v40_v0 = vld [vmem:[#allocation5] sm:$0xff]  ;;  %v41_v1 = vld [vmem:[#allocation5 + $0x8] sm:$0xff]  ;;  %vm60_vm0 = vcmask 523264   ;;  %vm183_vm1 = vcmask 261120  }
  0x27   :  { %v42_v2 = vld [vmem:[#allocation5 + $0x10] sm:$0xff]  ;;  %v3255_v3 = vpack.c.bf16 %v41_v1, %v40_v0  ;;  %v43_v4 = vld [vmem:[#allocation5 + $0x18] sm:$0xff]  ;;  %v44_v6 = vld [vmem:[#allocation5 + $0x20] sm:$0xff]  ;;  %s3645_s1 = smov 96   ;;  %vm3646_vm2 = vmmov 0   ;;  %s3648_s6 = smov 80  }
  0x28   :  { %v3259_v5 = vpack.c.bf16 %v43_v4, %v42_v2  ;;  %v45_v7 = vld [vmem:[#allocation5 + $0x28] sm:$0xff]  ;;  %v54_v8 = vld [vmem:[#allocation2] sm:$0xff]  ;;  %v47_v11 = vld [vmem:[#allocation5 + $0x38] sm:$0xff]  ;;  %s3649_s7 = smov 112   ;;  %vm421_vm3 = vcmask 130048   ;;  %vm520_vm6 = vcmask 195584  }
  0x29   :  { %3256 = vmatprep.subr.bf16.mxu0 %v3255_v3  ;;  %2961 = vmatprep.mubr.msk.f32.mxu0 %vm60_vm0, %v54_v8  ;;  %v3263_v9 = vpack.c.bf16 %v45_v7, %v44_v6  ;;  %v46_v10 = vld [vmem:[#allocation5 + $0x30] sm:$0xff]  ;;  %v55_v13 = vld [vmem:[#allocation2 + $0x8] sm:$0xff]  ;;  %v56_v14 = vld [vmem:[#allocation2 + $0x10] sm:$0xff]  ;;  %s3651_s8 = smov 64   ;;  %s3652_s9 = smov 48   ;;  %vm2605_vm7 = vcmask 1040384  }
  0x2a   :  { %3258 = vmatpush3.bf16.msra.mxu0 %v3255_v3  ;;  %v3267_v12 = vpack.c.bf16 %v47_v11, %v46_v10  ;;  %v57_v15 = vld [vmem:[#allocation2 + $0x18] sm:$0xff]  ;;  %v58_v16 = vld [vmem:[#allocation2 + $0x20] sm:$0xff]  ;;  %v59_v17 = vld [vmem:[#allocation2 + $0x28] sm:$0xff]  ;;  %s3653_s10 = smov 16   ;;  %vm2689_vm8 = vcmask 1041408   ;;  %s3654_s11 = smov [#allocation7]  }
  0x2b   :  { %3260 = vmatprep.subr.bf16.mxu0 %v3259_v5  ;;  %v49_v18 = vld [vmem:[#allocation5 + $0x48] sm:$0xff]  ;;  %v48_v19 = vld [vmem:[#allocation5 + $0x40] sm:$0xff]  ;;  %v50_v24 = vld [vmem:[#allocation5 + $0x50] sm:$0xff]  ;;  %s2708_s12 = sshll.u32 %s3654_s11, 4  ;;  %s2709_s12 = int_to_ptr.vmem [resolvable:$true] %s2708_s12 }
  0x2c   :  { %v51_v28 = vld [vmem:[#allocation5 + $0x58] sm:$0xff]  ;;  %v52_v40 = vld [vmem:[#allocation5 + $0x60] sm:$0xff]  ;;  %v53_v42 = vld [vmem:[#allocation5 + $0x68] sm:$0xff]  ;;  %s3612_s13 = scalar_lea.vmem %s2709_s12, 32  ;;  %p3617_p3 = scmp.lt.s32.totalorder %s2709_s12, %s2709_s12 }
  0x2d   :  { %v179_v54 = vld [vmem:[#allocation5 + $0x80] sm:$0xff]  ;;  %v180_v55 = vld [vmem:[#allocation5 + $0x88] sm:$0xff]  ;;  %v181_v57 = vld [vmem:[#allocation5 + $0x90] sm:$0xff]  ;;  %p3613_p2 = scmp.ne.s32.totalorder %s2709_s12, %s3612_s13  ;;  %p3618_p4 = scmp.lt.s32.totalorder %s3612_s13, %s3612_s13 }
  0x2e   :  { %3262 = vmatpush3.bf16.msra.mxu0 %v3259_v5  ;;  %v3271_v56 = vpack.c.bf16 %v180_v55, %v179_v54  ;;  %v182_v58 = vld [vmem:[#allocation5 + $0x98] sm:$0xff]  ;;  %v174_v5 = vlaneseq  ;;  %vm3819_vm4 = vmpackc.low %vm421_vm3, %vm421_vm3 }
  0x2f   :  { %3264 = vmatprep.subr.bf16.mxu0 %v3263_v9  ;;  %v3275_v59 = vpack.c.bf16 %v182_v58, %v181_v57  ;;  %p3619_p5 = por %p3618_p4, %p3617_p3 }
  0x30   :  { %3272 = vmatprep.subr.bf16.mxu1 %v3271_v56 }
  0x31   :  { %3274 = vmatpush3.bf16.msra.mxu1 %v3271_v56  ;;  %p3620_p6 = pnand %p3619_p5, %p3613_p2 }
  0x32   :  { %3266 = vmatpush3.bf16.msra.mxu0 %v3263_v9  ;;  %3276 = vmatprep.subr.bf16.mxu1 %v3275_v59 }
  0x33   :  { %3268 = vmatprep.subr.bf16.mxu0 %v3267_v12 }
  0x35   :  { %3278 = vmatpush3.bf16.msra.mxu1 %v3275_v59 }
  0x36   :  { %3270 = vmatpush3.bf16.msra.mxu0 %v3267_v12 }
  0x39   :  { %2962 = vmatmul.mubr.msk.f32.vlgmr.msra.gmra.mrb[0].mxu0 %vm60_vm0, %v55_v13  ;;  %v3743_v13 = vshrl.u32 %v174_v5, 7 }
  0x3a   :  { %2964 = vmatprep.mubr.msk.f32.mxu0 %vm60_vm0, %v56_v14 }
  0x3d   :  { %2965 = vmatmul.mubr.msk.f32.gmra.mrb[2].mxu0 %vm60_vm0, %v57_v15 }
  0x3e   :  { %2967 = vmatprep.mubr.msk.f32.mxu0 %vm60_vm0, %v58_v16 }
  0x41   :  { %2968 = vmatmul.mubr.msk.f32.gmra.mrb[4].mxu0 %vm60_vm0, %v59_v17 }
 0x10c   :  { %v2963_v20 = vpop.f32.mrb[0].mxu0 }
 0x10d   :  { %v145_v21 = vpop.f32.mrb[1].mxu0  ;;  %v3700_v22 = vadd.f32 %v2963_v20, %v49_v18  ;;  %v277_v20 = vsub.s32 0, %v3743_v13 }
 0x10e   :  { %v3702_v23 = vadd.f32 %v145_v21, %v48_v19 }
 0x10f   :  { %v210_v32 = vmul.f32 %v3700_v22, %v3700_v22  ;;  %v187_v34 = vsel %vm183_vm1, %v3700_v22, 0.0 }
 0x110   :  { %v184_v25 = vsel %vm183_vm1, %v3702_v23, 0.0  ;;  %v209_v26 = vmul.f32 %v3702_v23, %v3702_v23  ;;  %v2966_v27 = vpop.f32.mrb[2].mxu0 }
 0x111   :  { %185 = vadd.xlane.f32.xlu0 %v184_v25  ;;  %v155_v29 = vpop.f32.mrb[3].mxu0  ;;  %v3713_v33 = vadd.f32 %v2966_v27, %v51_v28  ;;  %v218_v37 = vsel %vm183_vm1, %v210_v32, 0.0  ;;  %v287_v28 = vsub.s32 1, %v3743_v13 }
 0x112   :  { %v215_v30 = vsel %vm183_vm1, %v209_v26, 0.0  ;;  %v3709_v31 = vadd.f32 %v155_v29, %v50_v24  ;;  %v3746_v26 = vld [vmem:[#allocation5 + $0x70] sm:$0xff] }
 0x113   :  { %216 = vadd.xlane.f32.xlu1 %v215_v30  ;;  %v193_v41 = vsel %vm183_vm1, %v3713_v33, 0.0  ;;  %v212_v45 = vmul.f32 %v3713_v33, %v3713_v33 }
 0x114   :  { %v2969_v35 = vpop.f32.mrb[4].mxu0  ;;  %v190_v38 = vsel %vm183_vm1, %v3709_v31, 0.0  ;;  %v211_v39 = vmul.f32 %v3709_v31, %v3709_v31 }
 0x115   :  { %188 = vadd.xlane.f32.xlu0 %v187_v34  ;;  %v165_v36 = vpop.f32.mrb[5].mxu0  ;;  %v3729_v46 = vadd.f32 %v2969_v35, %v53_v42  ;;  %v224_v47 = vsel %vm183_vm1, %v212_v45, 0.0 }
 0x116   :  { %v3724_v43 = vadd.f32 %v165_v36, %v52_v40  ;;  %v221_v44 = vsel %vm183_vm1, %v211_v39, 0.0  ;;  %v278_v36 = vrot.slane %v3746_v26, %v277_v20 }
 0x117   :  { %219 = vadd.xlane.f32.xlu1 %v218_v37  ;;  %v199_v50 = vsel %vm183_vm1, %v3729_v46, 0.0  ;;  %v214_v51 = vmul.f32 %v3729_v46, %v3729_v46 }
 0x118   :  { %v196_v48 = vsel %vm183_vm1, %v3724_v43, 0.0  ;;  %v213_v49 = vmul.f32 %v3724_v43, %v3724_v43 }
 0x119   :  { %191 = vadd.xlane.f32.xlu0 %v190_v38  ;;  %v230_v53 = vsel %vm183_vm1, %v214_v51, 0.0 }
 0x11a   :  { %v227_v52 = vsel %vm183_vm1, %v213_v49, 0.0 }
 0x11b   :  { %194 = vadd.xlane.f32.xlu1 %v193_v41 }
 0x11d   :  { %222 = vadd.xlane.f32.xlu0 %v221_v44  ;;  %v288_v44 = vrot.slane %v3746_v26, %v287_v28 }
 0x11f   :  { %225 = vadd.xlane.f32.xlu1 %v224_v47 }
 0x121   :  { %197 = vadd.xlane.f32.xlu0 %v196_v48 }
 0x123   :  { %200 = vadd.xlane.f32.xlu1 %v199_v50 }
 0x125   :  { %228 = vadd.xlane.f32.xlu0 %v227_v52 }
 0x127   :  { %231 = vadd.xlane.f32.xlu1 %v230_v53 }
 0x19e   :  { %v186_v60 = vpop.xlane.xlu0 %185 }
 0x19f   :  { %v203_v61 = vmul.f32 0.03125, %v186_v60 }
 0x1a0   :  { %v217_v62 = vpop.xlane.xlu1 %216 }
 0x1a1   :  { %v239_v63 = vmul.f32 %v203_v61, %v203_v61  ;;  %v233_v0 = vmul.f32 0.03125, %v217_v62  ;;  %v251_v34 = vsub.f32 %v3702_v23, %v203_v61 }
 0x1a2   :  { %v189_v1 = vpop.xlane.xlu0 %188 }
 0x1a3   :  { %v245_v2 = vsub.f32 %v233_v0, %v239_v63  ;;  %v204_v3 = vmul.f32 0.03125, %v189_v1 }
 0x1a4   :  { %v220_v4 = vpop.xlane.xlu1 %219 }
 0x1a5   :  { %v257_v6 = vadd.f32 1e-05, %v245_v2  ;;  %v240_v7 = vmul.f32 %v204_v3, %v204_v3  ;;  %v234_v8 = vmul.f32 0.03125, %v220_v4  ;;  %v252_v47 = vsub.f32 %v3700_v22, %v204_v3 }
 0x1a6   :  { %v192_v9 = vpop.xlane.xlu0 %191 }
 0x1a7   :  { %3444 = vrsqrt.f32 %v257_v6  ;;  %v246_v10 = vsub.f32 %v234_v8, %v240_v7  ;;  %v205_v11 = vmul.f32 0.03125, %v192_v9 }
 0x1a8   :  { %v195_v12 = vpop.xlane.xlu1 %194 }
 0x1a9   :  { %v258_v14 = vadd.f32 1e-05, %v246_v10  ;;  %v241_v15 = vmul.f32 %v205_v11, %v205_v11  ;;  %v206_v16 = vmul.f32 0.03125, %v195_v12  ;;  %v253_v60 = vsub.f32 %v3709_v31, %v205_v11 }
 0x1aa   :  { %v223_v17 = vpop.xlane.xlu0 %222 }
 0x1ab   :  { %3446 = vrsqrt.f32 %v258_v14  ;;  %v235_v18 = vmul.f32 0.03125, %v223_v17  ;;  %v242_v21 = vmul.f32 %v206_v16, %v206_v16  ;;  %v254_v63 = vsub.f32 %v3713_v33, %v206_v16 }
 0x1ac   :  { %v226_v19 = vpop.xlane.xlu1 %225 }
 0x1ad   :  { %v247_v24 = vsub.f32 %v235_v18, %v241_v15  ;;  %v236_v25 = vmul.f32 0.03125, %v226_v19  ;;  %v297_v19 = vsub.s32 2, %v3743_v13 }
 0x1ae   :  { %v198_v27 = vpop.xlane.xlu0 %197 }
 0x1af   :  { %v259_v29 = vadd.f32 1e-05, %v247_v24  ;;  %v248_v30 = vsub.f32 %v236_v25, %v242_v21  ;;  %v207_v32 = vmul.f32 0.03125, %v198_v27  ;;  %v3644_v21 = vmov 0.0|0.0  }
 0x1b0   :  { %v201_v35 = vpop.xlane.xlu1 %200  ;;  %3279 = vmatprep.subr.bf16.mxu1 %v3644_v21  ;;  %3283 = vmatprep.subr.bf16.mxu0 %v3644_v21  ;;  %v298_v24 = vrot.slane %v3746_v26, %v297_v19 }
 0x1b1   :  { %v3445_v37 = vpop.eup %3444  ;;  %3448 = vrsqrt.f32 %v259_v29  ;;  %v260_v38 = vadd.f32 1e-05, %v248_v30  ;;  %v243_v39 = vmul.f32 %v207_v32, %v207_v32  ;;  %v208_v40 = vmul.f32 0.03125, %v201_v35 }
 0x1b2   :  { %v229_v41 = vpop.xlane.xlu0 %228  ;;  %v269_v42 = vmul.f32 %v3445_v37, %v251_v34  ;;  %v255_v7 = vsub.f32 %v3724_v43, %v207_v32  ;;  %v3647_v34 = vmov 0.0  }
 0x1b3   :  { %3450 = vrsqrt.f32 %v260_v38  ;;  %v237_v45 = vmul.f32 0.03125, %v229_v41  ;;  %v244_v48 = vmul.f32 %v208_v40, %v208_v40  ;;  %v256_v10 = vsub.f32 %v3729_v46, %v208_v40  ;;  %3008 = vmatprep.mubr.msk.f32.mxu0 %vm3646_vm2, %v3647_v34 }
 0x1b4   :  { %v232_v49 = vpop.xlane.xlu1 %231  ;;  %v279_v50 = vmul.f32 %v278_v36, %v269_v42 }
 0x1b5   :  { %v3447_v51 = vpop.eup %3446  ;;  %v249_v52 = vsub.f32 %v237_v45, %v243_v39  ;;  %v238_v53 = vmul.f32 0.03125, %v232_v49 }
 0x1b6   :  { %v289_v54 = vadd.f32 %v288_v44, %v279_v50  ;;  %v270_v55 = vmul.f32 %v3447_v51, %v252_v47 }
 0x1b7   :  { %v261_v56 = vadd.f32 1e-05, %v249_v52  ;;  %v250_v57 = vsub.f32 %v238_v53, %v244_v48 }
 0x1b8   :  { %2978 = vmatprep.mubr.msk.f32.mxu1 %vm183_vm1, %v289_v54  ;;  %v280_v58 = vmul.f32 %v278_v36, %v270_v55 }
 0x1b9   :  { %3452 = vrsqrt.f32 %v261_v56  ;;  %v262_v59 = vadd.f32 1e-05, %v250_v57 }
 0x1ba   :  { %v290_v61 = vadd.f32 %v288_v44, %v280_v58 }
 0x1bb   :  { %v3449_v62 = vpop.eup %3448  ;;  %3454 = vrsqrt.f32 %v262_v59 }
 0x1bc   :  { %2979 = vmatmul.mubr.msk.f32.vlgmr.msra.gmra.mrb[0].mxu1 %vm183_vm1, %v290_v61  ;;  %v271_v0 = vmul.f32 %v3449_v62, %v253_v60 }
 0x1bd   :  { %v3451_v1 = vpop.eup %3450 }
 0x1be   :  { %v281_v2 = vmul.f32 %v278_v36, %v271_v0  ;;  %v272_v3 = vmul.f32 %v3451_v1, %v254_v63 }
 0x1c0   :  { %v291_v4 = vadd.f32 %v288_v44, %v281_v2  ;;  %v282_v6 = vmul.f32 %v278_v36, %v272_v3 }
 0x1c2   :  { %2981 = vmatprep.mubr.msk.f32.mxu1 %vm183_vm1, %v291_v4  ;;  %v292_v8 = vadd.f32 %v288_v44, %v282_v6 }
 0x1c3   :  { %v3453_v9 = vpop.eup %3452 }
 0x1c4   :  { %2982 = vmatmul.mubr.msk.f32.gmra.mrb[2].mxu1 %vm183_vm1, %v292_v8  ;;  %v273_v11 = vmul.f32 %v3453_v9, %v255_v7  ;;  %v175_v9 = vand.u32 127, %v174_v5 }
 0x1c5   :  { %v3455_v12 = vpop.eup %3454 }
 0x1c6   :  { %v283_v14 = vmul.f32 %v278_v36, %v273_v11  ;;  %v274_v15 = vmul.f32 %v3455_v12, %v256_v10  ;;  %vm176_vm5 = vcmp.lt.s32.totalorder %v175_v9, 17  ;;  %v3650_v10 = vmov -1e+30  }
 0x1c7   :  { %v3881_v11 = vsel %vm176_vm5, 0.0, %v3650_v10 }
 0x1c8   :  { %v293_v16 = vadd.f32 %v288_v44, %v283_v14  ;;  %v284_v17 = vmul.f32 %v278_v36, %v274_v15 }
 0x1ca   :  { %2984 = vmatprep.mubr.msk.f32.mxu1 %vm183_vm1, %v293_v16  ;;  %v294_v18 = vadd.f32 %v288_v44, %v284_v17 }
 0x1cc   :  { %2985 = vmatmul.mubr.msk.f32.gmra.mrb[4].mxu1 %vm183_vm1, %v294_v18 }
 0x1cd   :  { %2993 = vmatprep.mubr.msk.f32.mxu1 %vm3646_vm2, %v3647_v34 }
 0x28f   :  { %v2980_v25 = vpop.f32.mrb[0].mxu1 }
 0x290   :  { %v389_v27 = vadd.f32 %v2980_v25, %v298_v24  ;;  %v383_v29 = vpop.f32.mrb[1].mxu1 }
 0x291   :  { %v384_v30 = vadd.f32 %v383_v29, %v298_v24 }
 0x293   :  { %v3773_v32 = vpack.i.bf16 %v389_v27, %v384_v30 }
 0x295   :  { %3365 = vrot.lane.b32.xlu0 %v3773_v32, %s3645_s1 }
 0x297   :  { %v2983_v35 = vpop.f32.mrb[2].mxu1 }
 0x298   :  { %v3781_v26 = vadd.f32 %v2983_v35, %v298_v24  ;;  %v393_v36 = vpop.f32.mrb[3].mxu1 }
 0x299   :  { %v3783_v37 = vadd.f32 %v393_v36, %v298_v24 }
 0x29b   :  { %419 = vrot.lane.b32.xlu1 %v3783_v37, %s3645_s1 }
 0x29f   :  { %3370 = vrot.lane.b32.xlu1 %v3773_v32, %s3648_s6  ;;  %v2986_v38 = vpop.f32.mrb[4].mxu1 }
 0x2a0   :  { %v3789_v39 = vadd.f32 %v2986_v38, %v298_v24  ;;  %v403_v40 = vpop.f32.mrb[5].mxu1 }
 0x2a1   :  { %v3791_v41 = vadd.f32 %v403_v40, %v298_v24 }
 0x2a3   :  { %662 = vrot.lane.b32.xlu1 %v3783_v37, %s3648_s6  ;;  %v3797_v42 = vpack.i.bf16 %v3791_v41, %v3781_v26 }
 0x2a5   :  { %3375 = vrot.lane.b32.xlu0 %v3797_v42, %s3645_s1 }
 0x2a7   :  { %652 = vrot.lane.b32.xlu1 %v384_v30, %s3649_s7 }
 0x2a9   :  { %654 = vrot.lane.b32.xlu0 %v389_v27, %s3649_s7 }
 0x2ab   :  { %656 = vrot.lane.b32.xlu1 %v3783_v37, %s3649_s7 }
 0x2ad   :  { %915 = vrot.lane.b32.xlu0 %v3789_v39, %s3645_s1 }
 0x2af   :  { %3380 = vrot.lane.b32.xlu1 %v3797_v42, %s3648_s6 }
 0x2b1   :  { %1156 = vrot.lane.b32.xlu0 %v3789_v39, %s3648_s6 }
 0x2b3   :  { %1146 = vrot.lane.b32.xlu1 %v3781_v26, %s3649_s7 }
 0x2b5   :  { %1148 = vrot.lane.b32.xlu0 %v3791_v41, %s3649_s7 }
 0x2b7   :  { %1150 = vrot.lane.b32.xlu1 %v3789_v39, %s3649_s7 }
 0x307   :  { %v3366_v44 = vpop.permute.xlu0 %3365 }
 0x308   :  { %v3368_v45 = vunpack.i.h.bf16 %v3366_v44  ;;  %v3367_v47 = vunpack.i.l.bf16 %v3366_v44 }
 0x30a   :  { %v3280_v49 = vpack.c.bf16 %v3368_v45, %v3367_v47 }
 0x30c   :  { %3282 = vmatpush3.bf16.xpose.msk.msra.mxu1 %vm3819_vm4, %v3280_v49 }
 0x30d   :  { %v420_v50 = vpop.permute.xlu1 %419  ;;  %2991 = vmatprep.subr.mxu1 %v3647_v34 }
 0x311   :  { %v3371_v51 = vpop.permute.xlu1 %3370 }
 0x312   :  { %v3373_v52 = vunpack.i.h.bf16 %v3371_v51  ;;  %v3372_v53 = vunpack.i.l.bf16 %v3371_v51 }
 0x314   :  { %2992 = vmatpush3.xpose.msk.msra.mxu1 %vm421_vm3, %v420_v50  ;;  %v3287_v55 = vpack.c.bf16 %v3373_v52, %v3372_v53 }
 0x315   :  { %v663_v54 = vpop.permute.xlu1 %662  ;;  %3286 = vmatprep.subr.bf16.mxu1 %v3644_v21 }
 0x317   :  { %2994 = vmatmul.mubr.msk.f32.vlgmr.msra.gmra.mrb[6].mxu1 %vm421_vm3, %v384_v30  ;;  %v3376_v56 = vpop.permute.xlu0 %3375 }
 0x318   :  { %3289 = vmatpush3.bf16.xpose.msk.msra.mxu1 %vm3819_vm4, %v3287_v55  ;;  %2996 = vmatprep.mubr.msk.f32.mxu1 %vm3646_vm2, %v3647_v34  ;;  %v3378_v58 = vunpack.i.h.bf16 %v3376_v56  ;;  %v3377_v59 = vunpack.i.l.bf16 %v3376_v56 }
 0x319   :  { %3021 = vmatprep.subr.mxu1 %v3647_v34  ;;  %v653_v57 = vpop.permute.xlu1 %652 }
 0x31a   :  { %v3294_v61 = vpack.c.bf16 %v3378_v58, %v3377_v59 }
 0x31b   :  { %2997 = vmatmul.mubr.msk.f32.gmra.mrb[8].mxu1 %vm421_vm3, %v389_v27  ;;  %v655_v62 = vpop.permute.xlu0 %654 }
 0x31c   :  { %2999 = vmatprep.mubr.msk.f32.mxu1 %vm3646_vm2, %v3647_v34 }
 0x31d   :  { %v657_v60 = vpop.permute.xlu1 %656 }
 0x31f   :  { %3000 = vmatmul.mubr.msk.f32.gmra.mrb[10].mxu1 %vm421_vm3, %v3783_v37  ;;  %v916_v2 = vpop.permute.xlu0 %915 }
 0x320   :  { %3022 = vmatpush3.xpose.msk.msra.mxu1 %vm421_vm3, %v663_v54  ;;  %3023 = vmatprep.mubr.msk.f32.mxu1 %vm3646_vm2, %v3647_v34 }
 0x321   :  { %3293 = vmatprep.subr.bf16.mxu1 %v3644_v21  ;;  %v3381_v63 = vpop.permute.xlu1 %3380 }
 0x322   :  { %v3383_v0 = vunpack.i.h.bf16 %v3381_v63  ;;  %v3382_v1 = vunpack.i.l.bf16 %v3381_v63 }
 0x323   :  { %3024 = vmatmul.mubr.msk.f32.vlgmr.msra.gmra.mrb[12].mxu1 %vm421_vm3, %v653_v57  ;;  %v1157_v4 = vpop.permute.xlu0 %1156 }
 0x324   :  { %3296 = vmatpush3.bf16.xpose.msk.msra.mxu1 %vm3819_vm4, %v3294_v61  ;;  %3026 = vmatprep.mubr.msk.f32.mxu1 %vm3646_vm2, %v3647_v34  ;;  %v3301_v3 = vpack.c.bf16 %v3383_v0, %v3382_v1 }
 0x325   :  { %3051 = vmatprep.subr.mxu1 %v3647_v34  ;;  %v1147_v6 = vpop.permute.xlu1 %1146 }
 0x327   :  { %3027 = vmatmul.mubr.msk.f32.gmra.mrb[14].mxu1 %vm421_vm3, %v655_v62  ;;  %v1149_v7 = vpop.permute.xlu0 %1148 }
 0x328   :  { %3029 = vmatprep.mubr.msk.f32.mxu1 %vm3646_vm2, %v3647_v34 }
 0x329   :  { %v1151_v8 = vpop.permute.xlu1 %1150 }
 0x32b   :  { %3030 = vmatmul.mubr.msk.f32.gmra.mrb[16].mxu1 %vm421_vm3, %v657_v60 }
 0x32c   :  { %3052 = vmatpush3.xpose.msk.msra.mxu1 %vm421_vm3, %v916_v2  ;;  %3053 = vmatprep.mubr.msk.f32.mxu1 %vm3646_vm2, %v3647_v34 }
 0x32d   :  { %3300 = vmatprep.subr.bf16.mxu1 %v3644_v21 }
 0x32f   :  { %3054 = vmatmul.mubr.msk.f32.vlgmr.msra.gmra.mrb[18].mxu1 %vm421_vm3, %v3781_v26 }
 0x330   :  { %3303 = vmatpush3.bf16.xpose.msk.msra.mxu1 %vm3819_vm4, %v3301_v3  ;;  %3056 = vmatprep.mubr.msk.f32.mxu1 %vm3646_vm2, %v3647_v34 }
 0x331   :  { %3081 = vmatprep.subr.mxu1 %v3647_v34 }
 0x333   :  { %3057 = vmatmul.mubr.msk.f32.gmra.mrb[20].mxu1 %vm421_vm3, %v3791_v41 }
 0x334   :  { %3059 = vmatprep.mubr.msk.f32.mxu1 %vm3646_vm2, %v3647_v34 }
 0x337   :  { %3060 = vmatmul.mubr.msk.f32.gmra.mrb[22].mxu1 %vm421_vm3, %v3789_v39 }
 0x338   :  { %3082 = vmatpush3.xpose.msk.msra.mxu1 %vm421_vm3, %v1157_v4  ;;  %3083 = vmatprep.mubr.msk.f32.mxu1 %vm3646_vm2, %v3647_v34 }
 0x33b   :  { %3084 = vmatmul.mubr.msk.f32.vlgmr.msra.gmra.mrb[24].mxu1 %vm421_vm3, %v1147_v6 }
 0x33c   :  { %3086 = vmatprep.mubr.msk.f32.mxu1 %vm3646_vm2, %v3647_v34 }
 0x33f   :  { %3087 = vmatmul.mubr.msk.f32.gmra.mrb[26].mxu1 %vm421_vm3, %v1149_v7 }
 0x340   :  { %3089 = vmatprep.mubr.msk.f32.mxu1 %vm3646_vm2, %v3647_v34 }
 0x343   :  { %3090 = vmatmul.mubr.msk.f32.gmra.mrb[28].mxu1 %vm421_vm3, %v1151_v8 }
 0x3ea   :  { %v500_v12 = vpop.f32.mrb[6].mxu1 }
 0x3eb   :  { %v514_v14 = vmul.f32 0.25, %v500_v12  ;;  %v2995_v15 = vpop.f32.mrb[7].mxu1 }
 0x3ed   :  { %v3884_v16 = vadd.f32 %v514_v14, %v3881_v11 }
 0x3ee   :  { %v505_v17 = vpop.f32.mrb[8].mxu1 }
 0x3ef   :  { %v515_v18 = vmul.f32 0.25, %v505_v17  ;;  %v2998_v24 = vpop.f32.mrb[9].mxu1  ;;  %v521_v25 = vsel %vm520_vm6, %v3884_v16, -inf }
 0x3f0   :  { %522 = vmax.xlane.f32.xlu0 %v521_v25 }
 0x3f1   :  { %v3889_v5 = vadd.f32 %v515_v18, %v3881_v11 }
 0x3f2   :  { %v510_v27 = vpop.f32.mrb[10].mxu1 }
 0x3f3   :  { %v516_v29 = vmul.f32 0.25, %v510_v27  ;;  %v3001_v30 = vpop.f32.mrb[11].mxu1  ;;  %v524_v35 = vsel %vm520_vm6, %v3889_v5, -inf }
 0x3f4   :  { %525 = vmax.xlane.f32.xlu1 %v524_v35 }
 0x3f5   :  { %v3894_v26 = vadd.f32 %v516_v29, %v3881_v11 }
 0x3f6   :  { %v742_v36 = vpop.f32.mrb[12].mxu1 }
 0x3f7   :  { %v756_v38 = vmul.f32 0.25, %v742_v36  ;;  %v3025_v40 = vpop.f32.mrb[13].mxu1  ;;  %v527_v41 = vsel %vm520_vm6, %v3894_v26, -inf }
 0x3f8   :  { %528 = vmax.xlane.f32.xlu0 %v527_v41 }
 0x3f9   :  { %v3899_v44 = vadd.f32 %v756_v38, %v3881_v11 }
 0x3fa   :  { %v747_v45 = vpop.f32.mrb[14].mxu1 }
 0x3fb   :  { %v757_v47 = vmul.f32 0.25, %v747_v45  ;;  %v3028_v49 = vpop.f32.mrb[15].mxu1  ;;  %v762_v50 = vsel %vm520_vm6, %v3899_v44, -inf }
 0x3fc   :  { %763 = vmax.xlane.f32.xlu0 %v762_v50 }
 0x3fd   :  { %v3904_v51 = vadd.f32 %v757_v47, %v3881_v11 }
 0x3fe   :  { %v752_v52 = vpop.f32.mrb[16].mxu1 }
 0x3ff   :  { %v758_v53 = vmul.f32 0.25, %v752_v52  ;;  %v3031_v54 = vpop.f32.mrb[17].mxu1  ;;  %v765_v55 = vsel %vm520_vm6, %v3904_v51, -inf }
 0x400   :  { %766 = vmax.xlane.f32.xlu0 %v765_v55 }
 0x401   :  { %v3909_v56 = vadd.f32 %v758_v53, %v3881_v11 }
 0x402   :  { %v995_v57 = vpop.f32.mrb[18].mxu1 }
 0x403   :  { %v1009_v58 = vmul.f32 0.25, %v995_v57  ;;  %v3055_v59 = vpop.f32.mrb[19].mxu1  ;;  %v768_v60 = vsel %vm520_vm6, %v3909_v56, -inf }
 0x404   :  { %769 = vmax.xlane.f32.xlu1 %v768_v60 }
 0x405   :  { %v3914_v61 = vadd.f32 %v1009_v58, %v3881_v11 }
 0x406   :  { %v1000_v62 = vpop.f32.mrb[20].mxu1 }
 0x407   :  { %v1010_v63 = vmul.f32 0.25, %v1000_v62  ;;  %v3058_v0 = vpop.f32.mrb[21].mxu1  ;;  %v1015_v1 = vsel %vm520_vm6, %v3914_v61, -inf }
 0x408   :  { %1016 = vmax.xlane.f32.xlu0 %v1015_v1 }
 0x409   :  { %v3919_v2 = vadd.f32 %v1010_v63, %v3881_v11 }
 0x40a   :  { %v1005_v3 = vpop.f32.mrb[22].mxu1 }
 0x40b   :  { %v3061_v4 = vpop.f32.mrb[23].mxu1  ;;  %v1018_v6 = vsel %vm520_vm6, %v3919_v2, -inf  ;;  %v1011_v15 = vmul.f32 0.25, %v1005_v3 }
 0x40c   :  { %1019 = vmax.xlane.f32.xlu1 %v1018_v6 }
 0x40d   :  { %v3930_v25 = vadd.f32 %v1011_v15, %v3881_v11 }
 0x40e   :  { %v1236_v7 = vpop.f32.mrb[24].mxu1 }
 0x40f   :  { %v3085_v8 = vpop.f32.mrb[25].mxu1  ;;  %v1250_v17 = vmul.f32 0.25, %v1236_v7  ;;  %v1021_v29 = vsel %vm520_vm6, %v3930_v25, -inf }
 0x411   :  { %v3933_v27 = vadd.f32 %v1250_v17, %v3881_v11 }
 0x412   :  { %v1241_v9 = vpop.f32.mrb[26].mxu1 }
 0x413   :  { %v3088_v10 = vpop.f32.mrb[27].mxu1  ;;  %v1251_v18 = vmul.f32 0.25, %v1241_v9  ;;  %v1256_v30 = vsel %vm520_vm6, %v3933_v27, -inf }
 0x415   :  { %v3940_v35 = vadd.f32 %v1251_v18, %v3881_v11 }
 0x416   :  { %v1246_v12 = vpop.f32.mrb[28].mxu1 }
 0x417   :  { %v3091_v14 = vpop.f32.mrb[29].mxu1  ;;  %v1252_v24 = vmul.f32 0.25, %v1246_v12  ;;  %v1259_v36 = vsel %vm520_vm6, %v3940_v35, -inf }
 0x41d   :  { %3385 = vrot.lane.b32.xlu1 %v3773_v32, %s3651_s8 }
 0x41e   :  { %558 = vrot.lane.b32.xlu0 %v3783_v37, %s3651_s8 }
 0x422   :  { %3390 = vrot.lane.b32.xlu0 %v3773_v32, %s3652_s9  ;;  %v3943_v32 = vadd.f32 %v1252_v24, %v3881_v11 }
 0x424   :  { %v1262_v38 = vsel %vm520_vm6, %v3943_v32, -inf }
 0x441   :  { %1022 = vmax.xlane.f32.xlu0 %v1021_v29  ;;  %1257 = vmax.xlane.f32.xlu1 %v1256_v30 }
 0x445   :  { %1260 = vmax.xlane.f32.xlu0 %v1259_v36  ;;  %1263 = vmax.xlane.f32.xlu1 %v1262_v38 }
 0x456   :  { %799 = vrot.lane.b32.xlu1 %v3783_v37, %s3652_s9 }
 0x45b   :  { %3395 = vrot.lane.b32.xlu0 %v3797_v42, %s3651_s8 }
 0x47d   :  { %v523_v40 = vpop.xlane.xlu0 %522 }
 0x47e   :  { %v530_v41 = vsub.f32 %v3884_v16, %v523_v40 }
 0x480   :  { %v533_v45 = vmul.f32 1.442695, %v530_v41 }
 0x481   :  { %v526_v47 = vpop.xlane.xlu1 %525 }
 0x482   :  { %3456 = vpow2.f32 %v533_v45  ;;  %v531_v49 = vsub.f32 %v3889_v5, %v526_v47 }
 0x484   :  { %v535_v50 = vmul.f32 1.442695, %v531_v49 }
 0x485   :  { %v529_v52 = vpop.xlane.xlu0 %528 }
 0x486   :  { %3458 = vpow2.f32 %v535_v50  ;;  %v532_v53 = vsub.f32 %v3894_v26, %v529_v52 }
 0x488   :  { %v537_v54 = vmul.f32 1.442695, %v532_v53 }
 0x489   :  { %v764_v55 = vpop.xlane.xlu0 %763 }
 0x48a   :  { %3460 = vpow2.f32 %v537_v54  ;;  %v771_v37 = vsub.f32 %v3899_v44, %v764_v55 }
 0x48c   :  { %v3957_v57 = vpop.eup %3456  ;;  %v774_v58 = vmul.f32 1.442695, %v771_v37 }
 0x48d   :  { %v539_v16 = vsel %vm520_vm6, %v3957_v57, 0.0  ;;  %v767_v3 = vpop.xlane.xlu0 %766 }
 0x48e   :  { %3462 = vpow2.f32 %v774_v58  ;;  %540 = vadd.xlane.f32.xlu0 %v539_v16  ;;  %v772_v15 = vsub.f32 %v3904_v51, %v767_v3 }
 0x490   :  { %v3961_v59 = vpop.eup %3458  ;;  %v776_v17 = vmul.f32 1.442695, %v772_v15 }
 0x491   :  { %v542_v5 = vsel %vm520_vm6, %v3961_v59, 0.0  ;;  %v770_v60 = vpop.xlane.xlu1 %769 }
 0x492   :  { %543 = vadd.xlane.f32.xlu1 %v542_v5  ;;  %v773_v18 = vsub.f32 %v3909_v56, %v770_v60 }
 0x494   :  { %v3965_v26 = vpop.eup %3460  ;;  %v778_v24 = vmul.f32 1.442695, %v773_v18 }
 0x495   :  { %v545_v44 = vsel %vm520_vm6, %v3965_v26, 0.0  ;;  %v1017_v9 = vpop.xlane.xlu0 %1016 }
 0x496   :  { %546 = vadd.xlane.f32.xlu0 %v545_v44  ;;  %v1024_v29 = vsub.f32 %v3914_v61, %v1017_v9 }
 0x498   :  { %v3969_v62 = vpop.eup %3462  ;;  %v1027_v30 = vmul.f32 1.442695, %v1024_v29 }
 0x499   :  { %v1020_v63 = vpop.xlane.xlu1 %1019  ;;  %v780_v0 = vsel %vm520_vm6, %v3969_v62, 0.0  ;;  %v559_v12 = vpop.permute.xlu0 %558 }
 0x49a   :  { %v1025_v1 = vsub.f32 %v3919_v2, %v1020_v63  ;;  %781 = vadd.xlane.f32.xlu1 %v780_v0 }
 0x49c   :  { %v1029_v4 = vmul.f32 1.442695, %v1025_v1 }
 0x49d   :  { %v3386_v6 = vpop.permute.xlu1 %3385  ;;  %v3391_v38 = vpop.permute.xlu0 %3390 }
 0x49e   :  { %3464 = vpow2.f32 %v1029_v4  ;;  %v3388_v7 = vunpack.i.h.bf16 %v3386_v6  ;;  %v3387_v8 = vunpack.i.l.bf16 %v3386_v6  ;;  %v3392_v9 = vunpack.i.l.bf16 %v3391_v38 }
 0x49f   :  { %3466 = vpow2.f32 %v776_v17 }
 0x4a0   :  { %v3284_v10 = vpack.c.bf16 %v3388_v7, %v3387_v8  ;;  %3468 = vpow2.f32 %v778_v24  ;;  %v3393_v8 = vunpack.i.h.bf16 %v3391_v38 }
 0x4a1   :  { %3470 = vpow2.f32 %v1027_v30 }
 0x4a2   :  { %3285 = vmatpush3.bf16.msra.mxu0 %v3284_v10  ;;  %v3291_v15 = vpack.c.bf16 %v3393_v8, %v3392_v9 }
 0x4a3   :  { %3006 = vmatprep.subr.mxu0 %v3647_v34 }
 0x4a6   :  { %3007 = vmatpush3.msra.mxu0 %v559_v12 }
 0x4a7   :  { %3290 = vmatprep.subr.bf16.mxu0 %v3644_v21 }
 0x4a8   :  { %v3975_v14 = vpop.eup %3464 }
 0x4a9   :  { %v1036_v2 = vsel %vm520_vm6, %v3975_v14, 0.0  ;;  %v3985_v36 = vpop.eup %3466 }
 0x4aa   :  { %1037 = vadd.xlane.f32.xlu1 %v1036_v2  ;;  %v783_v40 = vsel %vm520_vm6, %v3985_v36, 0.0  ;;  %v3989_v41 = vpop.eup %3468 }
 0x4ab   :  { %v786_v56 = vsel %vm520_vm6, %v3989_v41, 0.0  ;;  %v3993_v47 = vpop.eup %3470 }
 0x4ac   :  { %1052 = vrot.lane.b32.xlu0 %v3789_v39, %s3651_s8  ;;  %v1033_v55 = vsel %vm520_vm6, %v3993_v47, 0.0 }
 0x4cb   :  { %784 = vadd.xlane.f32.xlu0 %v783_v40 }
 0x4ce   :  { %v1023_v51 = vpop.xlane.xlu0 %1022  ;;  %v1258_v45 = vpop.xlane.xlu1 %1257 }
 0x4cf   :  { %v1026_v61 = vsub.f32 %v3930_v25, %v1023_v51  ;;  %v1265_v49 = vsub.f32 %v3933_v27, %v1258_v45  ;;  %787 = vadd.xlane.f32.xlu0 %v786_v56 }
 0x4d1   :  { %v1031_v50 = vmul.f32 1.442695, %v1026_v61  ;;  %v1268_v52 = vmul.f32 1.442695, %v1265_v49 }
 0x4d2   :  { %v1261_v53 = vpop.xlane.xlu0 %1260  ;;  %v1264_v54 = vpop.xlane.xlu1 %1263 }
 0x4d3   :  { %3472 = vpow2.f32 %v1031_v50  ;;  %v1266_v37 = vsub.f32 %v3940_v35, %v1261_v53  ;;  %v1267_v58 = vsub.f32 %v3943_v32, %v1264_v54  ;;  %1034 = vadd.xlane.f32.xlu0 %v1033_v55 }
 0x4d4   :  { %3474 = vpow2.f32 %v1268_v52 }
 0x4d5   :  { %v1270_v16 = vmul.f32 1.442695, %v1266_v37  ;;  %v1272_v5 = vmul.f32 1.442695, %v1267_v58 }
 0x4d6   :  { %v3396_v1 = vpop.permute.xlu0 %3395  ;;  %v800_v3 = vpop.permute.xlu1 %799 }
 0x4d7   :  { %3476 = vpow2.f32 %v1270_v16  ;;  %v3398_v18 = vunpack.i.h.bf16 %v3396_v1  ;;  %v3397_v24 = vunpack.i.l.bf16 %v3396_v1 }
 0x4d8   :  { %3478 = vpow2.f32 %v1272_v5 }
 0x4d9   :  { %v3298_v30 = vpack.c.bf16 %v3398_v18, %v3397_v24 }
 0x4dd   :  { %v4001_v25 = vpop.eup %3472 }
 0x4de   :  { %v4003_v27 = vpop.eup %3474  ;;  %v1039_v60 = vsel %vm520_vm6, %v4001_v25, 0.0 }
 0x4df   :  { %1040 = vadd.xlane.f32.xlu0 %v1039_v60  ;;  %v1274_v44 = vsel %vm520_vm6, %v4003_v27, 0.0 }
 0x4e0   :  { %1275 = vadd.xlane.f32.xlu1 %v1274_v44 }
 0x4e1   :  { %v4009_v35 = vpop.eup %3476 }
 0x4e2   :  { %v4011_v32 = vpop.eup %3478  ;;  %v1277_v63 = vsel %vm520_vm6, %v4009_v35, 0.0 }
 0x4e3   :  { %v1280_v0 = vsel %vm520_vm6, %v4011_v32, 0.0 }
 0x4e4   :  { %1278 = vadd.xlane.f32.xlu1 %v1277_v63  ;;  %1281 = vadd.xlane.f32.xlu0 %v1280_v0 }
 0x4f5   :  { %3400 = vrot.lane.b32.xlu1 %v3797_v42, %s3652_s9 }
 0x4fa   :  { %1293 = vrot.lane.b32.xlu0 %v3789_v39, %s3652_s9 }
 0x51b   :  { %v541_v4 = vpop.xlane.xlu0 %540 }
 0x51c   :  { %3480 = vrcp.f32 %v541_v4 }
 0x51f   :  { %v544_v6 = vpop.xlane.xlu1 %543 }
 0x520   :  { %3482 = vrcp.f32 %v544_v6 }
 0x523   :  { %v547_v7 = vpop.xlane.xlu0 %546 }
 0x524   :  { %3484 = vrcp.f32 %v547_v7 }
 0x526   :  { %v3481_v10 = vpop.eup %3480 }
 0x527   :  { %v551_v12 = vmul.f32 %v3481_v10, %v3957_v57  ;;  %v782_v2 = vpop.xlane.xlu1 %781 }
 0x528   :  { %3486 = vrcp.f32 %v782_v2 }
 0x529   :  { %3009 = vmatmul.mubr.msk.f32.vlgmr.msra.gmra.mrb[6].mxu0 %vm520_vm6, %v551_v12 }
 0x52a   :  { %v3483_v42 = vpop.eup %3482  ;;  %3292 = vmatpush3.bf16.msra.mxu0 %v3291_v15  ;;  %3011 = vmatprep.mubr.msk.f32.mxu0 %vm3646_vm2, %v3647_v34 }
 0x52b   :  { %3036 = vmatprep.subr.mxu0 %v3647_v34  ;;  %v552_v39 = vmul.f32 %v3483_v42, %v3961_v59 }
 0x52d   :  { %3012 = vmatmul.mubr.msk.f32.gmra.mrb[8].mxu0 %vm520_vm6, %v552_v39 }
 0x52e   :  { %v3485_v17 = vpop.eup %3484  ;;  %3037 = vmatpush3.msra.mxu0 %v800_v3  ;;  %3014 = vmatprep.mubr.msk.f32.mxu0 %vm3646_vm2, %v3647_v34 }
 0x52f   :  { %v553_v57 = vmul.f32 %v3485_v17, %v3965_v26  ;;  %3297 = vmatprep.subr.bf16.mxu0 %v3644_v21  ;;  %v1053_v26 = vpop.permute.xlu0 %1052 }
 0x531   :  { %3015 = vmatmul.mubr.msk.f32.gmra.mrb[10].mxu0 %vm520_vm6, %v553_v57 }
 0x532   :  { %v3487_v29 = vpop.eup %3486  ;;  %3038 = vmatprep.mubr.msk.f32.mxu0 %vm3646_vm2, %v3647_v34 }
 0x533   :  { %v792_v59 = vmul.f32 %v3487_v29, %v3969_v62 }
 0x535   :  { %3039 = vmatmul.mubr.msk.f32.vlgmr.msra.gmra.mrb[12].mxu0 %vm520_vm6, %v792_v59 }
 0x536   :  { %3299 = vmatpush3.bf16.msra.mxu0 %v3298_v30  ;;  %3041 = vmatprep.mubr.msk.f32.mxu0 %vm3646_vm2, %v3647_v34 }
 0x537   :  { %3066 = vmatprep.subr.mxu0 %v3647_v34  ;;  %v1038_v51 = vpop.xlane.xlu1 %1037 }
 0x53a   :  { %3067 = vmatpush3.msra.mxu0 %v1053_v26 }
 0x53b   :  { %3304 = vmatprep.subr.bf16.mxu0 %v3644_v21 }
 0x558   :  { %v785_v38 = vpop.xlane.xlu0 %784 }
 0x559   :  { %3488 = vrcp.f32 %v785_v38 }
 0x55c   :  { %v788_v40 = vpop.xlane.xlu0 %787 }
 0x55d   :  { %3490 = vrcp.f32 %v788_v40 }
 0x560   :  { %v1035_v45 = vpop.xlane.xlu0 %1034 }
 0x561   :  { %3492 = vrcp.f32 %v1035_v45 }
 0x562   :  { %3494 = vrcp.f32 %v1038_v51 }
 0x563   :  { %v3489_v62 = vpop.eup %3488 }
 0x564   :  { %v793_v56 = vmul.f32 %v3489_v62, %v3985_v36 }
 0x566   :  { %3042 = vmatmul.mubr.msk.f32.gmra.mrb[14].mxu0 %vm520_vm6, %v793_v56 }
 0x567   :  { %v3491_v61 = vpop.eup %3490  ;;  %3044 = vmatprep.mubr.msk.f32.mxu0 %vm3646_vm2, %v3647_v34 }
 0x568   :  { %v794_v49 = vmul.f32 %v3491_v61, %v3989_v41 }
 0x56a   :  { %3045 = vmatmul.mubr.msk.f32.gmra.mrb[16].mxu0 %vm520_vm6, %v794_v49 }
 0x56b   :  { %v3493_v50 = vpop.eup %3492  ;;  %3068 = vmatprep.mubr.msk.f32.mxu0 %vm3646_vm2, %v3647_v34 }
 0x56c   :  { %v1045_v52 = vmul.f32 %v3493_v50, %v3993_v47  ;;  %v1041_v53 = vpop.xlane.xlu0 %1040  ;;  %v3495_v54 = vpop.eup %3494 }
 0x56d   :  { %3496 = vrcp.f32 %v1041_v53  ;;  %v1276_v36 = vpop.xlane.xlu1 %1275  ;;  %v1046_v41 = vmul.f32 %v3495_v54, %v3975_v14 }
 0x56e   :  { %3069 = vmatmul.mubr.msk.f32.vlgmr.msra.gmra.mrb[18].mxu0 %vm520_vm6, %v1045_v52  ;;  %3498 = vrcp.f32 %v1276_v36 }
 0x56f   :  { %3071 = vmatprep.mubr.msk.f32.mxu0 %vm3646_vm2, %v3647_v34 }
 0x571   :  { %v1279_v55 = vpop.xlane.xlu1 %1278  ;;  %v1282_v47 = vpop.xlane.xlu0 %1281 }
 0x572   :  { %3072 = vmatmul.mubr.msk.f32.gmra.mrb[20].mxu0 %vm520_vm6, %v1046_v41  ;;  %3500 = vrcp.f32 %v1279_v55 }
 0x573   :  { %3074 = vmatprep.mubr.msk.f32.mxu0 %vm3646_vm2, %v3647_v34  ;;  %3502 = vrcp.f32 %v1282_v47 }
 0x575   :  { %v3401_v37 = vpop.permute.xlu1 %3400  ;;  %v1294_v0 = vpop.permute.xlu0 %1293 }
 0x576   :  { %v3403_v58 = vunpack.i.h.bf16 %v3401_v37  ;;  %v3402_v16 = vunpack.i.l.bf16 %v3401_v37 }
 0x577   :  { %v3497_v5 = vpop.eup %3496 }
 0x578   :  { %v3305_v60 = vpack.c.bf16 %v3403_v58, %v3402_v16  ;;  %v1047_v44 = vmul.f32 %v3497_v5, %v4001_v25  ;;  %v3499_v63 = vpop.eup %3498 }
 0x579   :  { %v1286_v14 = vmul.f32 %v3499_v63, %v4003_v27 }
 0x57a   :  { %3306 = vmatpush3.bf16.msra.mxu0 %v3305_v60 }
 0x57b   :  { %3075 = vmatmul.mubr.msk.f32.gmra.mrb[22].mxu0 %vm520_vm6, %v1047_v44  ;;  %3096 = vmatprep.subr.mxu0 %v3647_v34 }
 0x57c   :  { %3098 = vmatprep.mubr.msk.f32.mxu0 %vm3646_vm2, %v3647_v34  ;;  %v3501_v1 = vpop.eup %3500 }
 0x57d   :  { %v1287_v25 = vmul.f32 %v3501_v1, %v4009_v35  ;;  %v3503_v3 = vpop.eup %3502 }
 0x57e   :  { %3097 = vmatpush3.msra.mxu0 %v1294_v0  ;;  %v1288_v27 = vmul.f32 %v3503_v3, %v4011_v32 }
 0x57f   :  { %3099 = vmatmul.mubr.msk.f32.vlgmr.msra.gmra.mrb[24].mxu0 %vm520_vm6, %v1286_v14  ;;  %3315 = vmatprep.subr.bf16.mxu0 %v3644_v21 }
 0x580   :  { %3101 = vmatprep.mubr.msk.f32.mxu0 %vm3646_vm2, %v3647_v34 }
 0x583   :  { %3102 = vmatmul.mubr.msk.f32.gmra.mrb[26].mxu0 %vm520_vm6, %v1287_v25 }
 0x584   :  { %3104 = vmatprep.mubr.msk.f32.mxu0 %vm3646_vm2, %v3647_v34 }
 0x587   :  { %3105 = vmatmul.mubr.msk.f32.gmra.mrb[28].mxu0 %vm520_vm6, %v1288_v27 }
 0x588   :  { %3130 = vmatprep.mubr.msk.f32.mxu0 %vm3646_vm2, %v3647_v34 }
 0x5fc   :  { %v638_v4 = vpop.f32.mrb[6].mxu0 }
 0x5fd   :  { %v3010_v6 = vpop.f32.mrb[7].mxu0 }
 0x600   :  { %v643_v7 = vpop.f32.mrb[8].mxu0 }
 0x601   :  { %v3013_v8 = vpop.f32.mrb[9].mxu0 }
 0x602   :  { %v1410_v8 = vld [vmem:[#allocation5 + $0xa8] sm:$0xff] }
 0x604   :  { %v648_v9 = vpop.f32.mrb[10].mxu0 }
 0x605   :  { %v3016_v10 = vpop.f32.mrb[11].mxu0 }
 0x608   :  { %v879_v35 = vpop.f32.mrb[12].mxu0 }
 0x609   :  { %896 = vrot.lane.b32.xlu1 %v879_v35, %s3653_s10  ;;  %v3040_v12 = vpop.f32.mrb[13].mxu0 }
 0x60a   :  { %v1411_v12 = vld [vmem:[#allocation5 + $0xb0] sm:$0xff] }
 0x639   :  { %v884_v2 = vpop.f32.mrb[14].mxu0 }
 0x63a   :  { %898 = vrot.lane.b32.xlu1 %v884_v2, %s3653_s10  ;;  %v3043_v32 = vpop.f32.mrb[15].mxu0  ;;  %v1412_v2 = vld [vmem:[#allocation5 + $0xb8] sm:$0xff] }
 0x63b   :  { %v3311_v32 = vpack.c.bf16 %v1412_v2, %v1411_v12 }
 0x63d   :  { %v889_v15 = vpop.f32.mrb[16].mxu0 }
 0x63e   :  { %900 = vrot.lane.b32.xlu1 %v889_v15, %s3653_s10  ;;  %v3046_v42 = vpop.f32.mrb[17].mxu0 }
 0x641   :  { %v1132_v39 = vpop.f32.mrb[18].mxu0 }
 0x642   :  { %v3070_v17 = vpop.f32.mrb[19].mxu0 }
 0x645   :  { %v1137_v57 = vpop.f32.mrb[20].mxu0 }
 0x646   :  { %v3073_v18 = vpop.f32.mrb[21].mxu0 }
 0x64e   :  { %v1142_v24 = vpop.f32.mrb[22].mxu0 }
 0x64f   :  { %v3076_v29 = vpop.f32.mrb[23].mxu0 }
 0x650   :  { %v4136_v29 = vld [vmem:[#allocation5 + $0x78] sm:$0xff] }
 0x652   :  { %v1373_v59 = vpop.f32.mrb[24].mxu0 }
 0x653   :  { %1390 = vrot.lane.b32.xlu1 %v1373_v59, %s3653_s10  ;;  %v3100_v30 = vpop.f32.mrb[25].mxu0  ;;  %v4141_v59 = vrot.slane %v4136_v29, %v277_v20 }
 0x656   :  { %v1378_v26 = vpop.f32.mrb[26].mxu0 }
 0x657   :  { %1392 = vrot.lane.b32.xlu1 %v1378_v26, %s3653_s10  ;;  %v3103_v38 = vpop.f32.mrb[27].mxu0 }
 0x658   :  { %v4147_v38 = vrot.slane %v4136_v29, %v287_v28 }
 0x65a   :  { %v1383_v40 = vpop.f32.mrb[28].mxu0 }
 0x65b   :  { %1394 = vrot.lane.b32.xlu1 %v1383_v40, %s3653_s10  ;;  %v3106_v51 = vpop.f32.mrb[29].mxu0 }
 0x67b   :  { %v897_v45 = vpop.permute.xlu1 %896 }
 0x67c   :  { %v905_v62 = vsel %vm421_vm3, %v638_v4, %v897_v45 }
 0x67d   :  { %v4083_v56 = vadd.f32 %v905_v62, %v3702_v23 }
 0x67f   :  { %v1413_v61 = vsel %vm183_vm1, %v4083_v56, 0.0  ;;  %v1437_v49 = vmul.f32 %v4083_v56, %v4083_v56 }
 0x680   :  { %1414 = vadd.xlane.f32.xlu0 %v1413_v61 }
 0x681   :  { %v1443_v50 = vsel %vm183_vm1, %v1437_v49, 0.0 }
 0x684   :  { %1444 = vadd.xlane.f32.xlu0 %v1443_v50 }
 0x6ac   :  { %v899_v52 = vpop.permute.xlu1 %898 }
 0x6ad   :  { %v906_v53 = vsel %vm421_vm3, %v643_v7, %v899_v52  ;;  %v1409_v7 = vld [vmem:[#allocation5 + $0xa0] sm:$0xff] }
 0x6ae   :  { %v4092_v54 = vadd.f32 %v906_v53, %v3700_v22 }
 0x6b0   :  { %v901_v36 = vpop.permute.xlu1 %900  ;;  %v1416_v23 = vsel %vm183_vm1, %v4092_v54, 0.0  ;;  %v1438_v41 = vmul.f32 %v4092_v54, %v4092_v54 }
 0x6b1   :  { %v907_v55 = vsel %vm421_vm3, %v648_v9, %v901_v36  ;;  %1417 = vadd.xlane.f32.xlu1 %v1416_v23 }
 0x6b2   :  { %v4100_v47 = vadd.f32 %v907_v55, %v3709_v31  ;;  %v1446_v37 = vsel %vm183_vm1, %v1438_v41, 0.0 }
 0x6b3   :  { %1447 = vadd.xlane.f32.xlu0 %v1446_v37 }
 0x6b4   :  { %v1419_v22 = vsel %vm183_vm1, %v4100_v47, 0.0  ;;  %v1439_v58 = vmul.f32 %v4100_v47, %v4100_v47 }
 0x6b6   :  { %v1449_v16 = vsel %vm183_vm1, %v1439_v58, 0.0 }
 0x6b7   :  { %1420 = vadd.xlane.f32.xlu0 %v1419_v22 }
 0x6bb   :  { %1450 = vadd.xlane.f32.xlu0 %v1449_v16 }
 0x6c5   :  { %v1391_v5 = vpop.permute.xlu1 %1390 }
 0x6c6   :  { %v1399_v60 = vsel %vm421_vm3, %v1132_v39, %v1391_v5 }
 0x6c7   :  { %v4110_v44 = vadd.f32 %v1399_v60, %v3713_v33 }
 0x6c9   :  { %v1393_v31 = vpop.permute.xlu1 %1392  ;;  %v1422_v63 = vsel %vm183_vm1, %v4110_v44, 0.0  ;;  %v1440_v14 = vmul.f32 %v4110_v44, %v4110_v44 }
 0x6ca   :  { %v1400_v0 = vsel %vm421_vm3, %v1137_v57, %v1393_v31  ;;  %1423 = vadd.xlane.f32.xlu1 %v1422_v63 }
 0x6cb   :  { %v4118_v1 = vadd.f32 %v1400_v0, %v3724_v43  ;;  %v1452_v33 = vsel %vm183_vm1, %v1440_v14, 0.0  ;;  %v3307_v43 = vpack.c.bf16 %v1410_v8, %v1409_v7 }
 0x6cd   :  { %v1395_v25 = vpop.permute.xlu1 %1394  ;;  %v1425_v3 = vsel %vm183_vm1, %v4118_v1, 0.0  ;;  %v1441_v27 = vmul.f32 %v4118_v1, %v4118_v1  ;;  %3308 = vmatprep.subr.bf16.mxu1 %v3307_v43 }
 0x6ce   :  { %v1401_v4 = vsel %vm421_vm3, %v1142_v24, %v1395_v25  ;;  %1426 = vadd.xlane.f32.xlu0 %v1425_v3  ;;  %1453 = vadd.xlane.f32.xlu1 %v1452_v33 }
 0x6cf   :  { %v4127_v6 = vadd.f32 %v1401_v4, %v3729_v46  ;;  %v1455_v9 = vsel %vm183_vm1, %v1441_v27, 0.0  ;;  %3310 = vmatpush3.bf16.msra.mxu1 %v3307_v43 }
 0x6d0   :  { %3312 = vmatprep.subr.bf16.mxu1 %v3311_v32 }
 0x6d1   :  { %v1428_v10 = vsel %vm183_vm1, %v4127_v6, 0.0  ;;  %v1442_v35 = vmul.f32 %v4127_v6, %v4127_v6 }
 0x6d2   :  { %1456 = vadd.xlane.f32.xlu0 %v1455_v9  ;;  %1429 = vadd.xlane.f32.xlu1 %v1428_v10 }
 0x6d3   :  { %v1458_v46 = vsel %vm183_vm1, %v1442_v35, 0.0  ;;  %3314 = vmatpush3.bf16.msra.mxu1 %v3311_v32 }
 0x6d4   :  { %3319 = vmatprep.subr.bf16.mxu1 %v3644_v21 }
 0x6d6   :  { %1459 = vadd.xlane.f32.xlu1 %v1458_v46 }
 0x70d   :  { %v1415_v15 = vpop.xlane.xlu0 %1414 }
 0x70e   :  { %v1431_v42 = vmul.f32 0.03125, %v1415_v15 }
 0x710   :  { %v1467_v17 = vmul.f32 %v1431_v42, %v1431_v42  ;;  %v1479_v30 = vsub.f32 %v4083_v56, %v1431_v42 }
 0x711   :  { %v1445_v39 = vpop.xlane.xlu0 %1444 }
 0x712   :  { %v1461_v57 = vmul.f32 0.03125, %v1445_v39 }
 0x714   :  { %v1473_v18 = vsub.f32 %v1461_v57, %v1467_v17 }
 0x716   :  { %v1485_v24 = vadd.f32 1e-05, %v1473_v18 }
 0x718   :  { %3504 = vrsqrt.f32 %v1485_v24 }
 0x722   :  { %v3505_v26 = vpop.eup %3504 }
 0x723   :  { %v1497_v40 = vmul.f32 %v3505_v26, %v1479_v30 }
 0x725   :  { %v1507_v51 = vmul.f32 %v4141_v59, %v1497_v40 }
 0x727   :  { %v1517_v45 = vadd.f32 %v4147_v38, %v1507_v51 }
 0x729   :  { %3115 = vmatprep.mubr.msk.f32.mxu1 %vm183_vm1, %v1517_v45 }
 0x73e   :  { %v1418_v62 = vpop.xlane.xlu1 %1417 }
 0x73f   :  { %v1432_v61 = vmul.f32 0.03125, %v1418_v62 }
 0x740   :  { %v1448_v49 = vpop.xlane.xlu0 %1447 }
 0x741   :  { %v1468_v20 = vmul.f32 %v1432_v61, %v1432_v61  ;;  %v1462_v50 = vmul.f32 0.03125, %v1448_v49  ;;  %v1480_v58 = vsub.f32 %v4092_v54, %v1432_v61 }
 0x743   :  { %v1474_v52 = vsub.f32 %v1462_v50, %v1468_v20 }
 0x744   :  { %v1421_v53 = vpop.xlane.xlu0 %1420 }
 0x745   :  { %v1486_v36 = vadd.f32 1e-05, %v1474_v52  ;;  %v1433_v23 = vmul.f32 0.03125, %v1421_v53 }
 0x747   :  { %3506 = vrsqrt.f32 %v1486_v36  ;;  %v1469_v28 = vmul.f32 %v1433_v23, %v1433_v23  ;;  %v1481_v14 = vsub.f32 %v4100_v47, %v1433_v23 }
 0x748   :  { %v1451_v41 = vpop.xlane.xlu0 %1450 }
 0x749   :  { %v1463_v55 = vmul.f32 0.03125, %v1451_v41 }
 0x74b   :  { %v1475_v37 = vsub.f32 %v1463_v55, %v1469_v28 }
 0x74d   :  { %v1487_v22 = vadd.f32 1e-05, %v1475_v37 }
 0x74f   :  { %3508 = vrsqrt.f32 %v1487_v22 }
 0x751   :  { %v3507_v16 = vpop.eup %3506 }
 0x752   :  { %v1498_v5 = vmul.f32 %v3507_v16, %v1480_v58 }
 0x754   :  { %v1508_v60 = vmul.f32 %v4141_v59, %v1498_v5 }
 0x756   :  { %v1518_v31 = vadd.f32 %v4147_v38, %v1508_v60 }
 0x757   :  { %v1424_v63 = vpop.xlane.xlu1 %1423 }
 0x758   :  { %v1434_v0 = vmul.f32 0.03125, %v1424_v63  ;;  %3116 = vmatmul.mubr.msk.f32.vlgmr.msra.gmra.mrb[30].mxu1 %vm183_vm1, %v1518_v31 }
 0x759   :  { %v3509_v25 = vpop.eup %3508 }
 0x75a   :  { %v1499_v3 = vmul.f32 %v3509_v25, %v1481_v14  ;;  %v1470_v4 = vmul.f32 %v1434_v0, %v1434_v0  ;;  %v1482_v24 = vsub.f32 %v4110_v44, %v1434_v0 }
 0x75b   :  { %v1427_v33 = vpop.xlane.xlu0 %1426  ;;  %v1454_v27 = vpop.xlane.xlu1 %1453 }
 0x75c   :  { %v1435_v7 = vmul.f32 0.03125, %v1427_v33  ;;  %v1464_v8 = vmul.f32 0.03125, %v1454_v27  ;;  %v1509_v54 = vmul.f32 %v4141_v59, %v1499_v3 }
 0x75e   :  { %v1476_v43 = vsub.f32 %v1464_v8, %v1470_v4  ;;  %v1519_v9 = vadd.f32 %v4147_v38, %v1509_v54  ;;  %v1471_v12 = vmul.f32 %v1435_v7, %v1435_v7  ;;  %v1483_v40 = vsub.f32 %v4118_v1, %v1435_v7 }
 0x75f   :  { %v1457_v10 = vpop.xlane.xlu0 %1456  ;;  %v1430_v35 = vpop.xlane.xlu1 %1429 }
 0x760   :  { %v1488_v2 = vadd.f32 1e-05, %v1476_v43  ;;  %v1465_v47 = vmul.f32 0.03125, %v1457_v10  ;;  %v1436_v32 = vmul.f32 0.03125, %v1430_v35  ;;  %3118 = vmatprep.mubr.msk.f32.mxu1 %vm183_vm1, %v1519_v9 }
 0x762   :  { %3510 = vrsqrt.f32 %v1488_v2  ;;  %v1477_v46 = vsub.f32 %v1465_v47, %v1471_v12  ;;  %v1472_v39 = vmul.f32 %v1436_v32, %v1436_v32  ;;  %v1484_v49 = vsub.f32 %v4127_v6, %v1436_v32 }
 0x763   :  { %v1460_v15 = vpop.xlane.xlu1 %1459  ;;  %v1526_v6 = vrot.slane %v4136_v29, %v297_v19 }
 0x764   :  { %v1489_v42 = vadd.f32 1e-05, %v1477_v46  ;;  %v1466_v17 = vmul.f32 0.03125, %v1460_v15 }
 0x766   :  { %3512 = vrsqrt.f32 %v1489_v42  ;;  %v1478_v57 = vsub.f32 %v1466_v17, %v1472_v39 }
 0x768   :  { %v1490_v18 = vadd.f32 1e-05, %v1478_v57 }
 0x76a   :  { %3514 = vrsqrt.f32 %v1490_v18 }
 0x76c   :  { %v3511_v30 = vpop.eup %3510 }
 0x76d   :  { %v1500_v26 = vmul.f32 %v3511_v30, %v1482_v24 }
 0x76f   :  { %v1510_v51 = vmul.f32 %v4141_v59, %v1500_v26 }
 0x770   :  { %v3513_v45 = vpop.eup %3512 }
 0x771   :  { %v1520_v62 = vadd.f32 %v4147_v38, %v1510_v51  ;;  %v1501_v61 = vmul.f32 %v3513_v45, %v1483_v40 }
 0x773   :  { %3119 = vmatmul.mubr.msk.f32.gmra.mrb[32].mxu1 %vm183_vm1, %v1520_v62  ;;  %v1511_v20 = vmul.f32 %v4141_v59, %v1501_v61 }
 0x774   :  { %v3515_v50 = vpop.eup %3514 }
 0x775   :  { %v1521_v52 = vadd.f32 %v4147_v38, %v1511_v20  ;;  %v1502_v53 = vmul.f32 %v3515_v50, %v1484_v49 }
 0x777   :  { %3121 = vmatprep.mubr.msk.f32.mxu1 %vm183_vm1, %v1521_v52  ;;  %v1512_v1 = vmul.f32 %v4141_v59, %v1502_v53 }
 0x779   :  { %v1522_v36 = vadd.f32 %v4147_v38, %v1512_v1 }
 0x77b   :  { %3122 = vmatmul.mubr.msk.f32.gmra.mrb[34].mxu1 %vm183_vm1, %v1522_v36 }
 0x77c   :  { %3145 = vmatprep.mubr.msk.f32.mxu1 %vm3646_vm2, %v3647_v34 }
 0x82b   :  { %v3117_v23 = vpop.f32.mrb[30].mxu1 }
 0x82c   :  { %v1617_v41 = vadd.f32 %v3117_v23, %v1526_v6  ;;  %v1611_v28 = vpop.f32.mrb[31].mxu1 }
 0x82d   :  { %v1612_v55 = vadd.f32 %v1611_v28, %v1526_v6 }
 0x82f   :  { %v4177_v37 = vpack.i.bf16 %v1617_v41, %v1612_v55 }
 0x831   :  { %3405 = vrot.lane.b32.xlu0 %v4177_v37, %s3645_s1 }
 0x846   :  { %v3120_v59 = vpop.f32.mrb[32].mxu1 }
 0x847   :  { %v1621_v38 = vpop.f32.mrb[33].mxu1  ;;  %v4187_v19 = vadd.f32 %v3120_v59, %v1526_v6 }
 0x848   :  { %v4181_v22 = vadd.f32 %v1621_v38, %v1526_v6 }
 0x84a   :  { %1647 = vrot.lane.b32.xlu1 %v4181_v22, %s3645_s1 }
 0x84e   :  { %v3123_v58 = vpop.f32.mrb[34].mxu1  ;;  %3410 = vrot.lane.b32.xlu1 %v4177_v37, %s3648_s6 }
 0x84f   :  { %v1631_v13 = vpop.f32.mrb[35].mxu1  ;;  %v4201_v5 = vadd.f32 %v3123_v58, %v1526_v6 }
 0x850   :  { %v4189_v29 = vadd.f32 %v1631_v13, %v1526_v6 }
 0x852   :  { %1886 = vrot.lane.b32.xlu1 %v4181_v22, %s3648_s6  ;;  %v4195_v16 = vpack.i.bf16 %v4189_v29, %v4187_v19 }
 0x854   :  { %3415 = vrot.lane.b32.xlu0 %v4195_v16, %s3645_s1 }
 0x856   :  { %1876 = vrot.lane.b32.xlu1 %v1612_v55, %s3649_s7 }
 0x858   :  { %1878 = vrot.lane.b32.xlu0 %v1617_v41, %s3649_s7 }
 0x85a   :  { %1880 = vrot.lane.b32.xlu1 %v4181_v22, %s3649_s7 }
 0x85c   :  { %2127 = vrot.lane.b32.xlu0 %v4201_v5, %s3645_s1 }
 0x85e   :  { %3420 = vrot.lane.b32.xlu1 %v4195_v16, %s3648_s6 }
 0x860   :  { %2366 = vrot.lane.b32.xlu0 %v4201_v5, %s3648_s6 }
 0x862   :  { %2356 = vrot.lane.b32.xlu1 %v4187_v19, %s3649_s7 }
 0x866   :  { %3425 = vrot.lane.b32.xlu1 %v4177_v37, %s3651_s8 }
 0x8a3   :  { %v3406_v60 = vpop.permute.xlu0 %3405 }
 0x8a4   :  { %v3408_v31 = vunpack.i.h.bf16 %v3406_v60  ;;  %v3407_v63 = vunpack.i.l.bf16 %v3406_v60 }
 0x8a6   :  { %v3316_v14 = vpack.c.bf16 %v3408_v31, %v3407_v63 }
 0x8a8   :  { %3318 = vmatpush3.bf16.xpose.msk.msra.mxu0 %vm3819_vm4, %v3316_v14 }
 0x8a9   :  { %3128 = vmatprep.subr.mxu0 %v3647_v34 }
 0x8bc   :  { %v1648_v0 = vpop.permute.xlu1 %1647 }
 0x8bd   :  { %3129 = vmatpush3.xpose.msk.msra.mxu0 %vm421_vm3, %v1648_v0 }
 0x8be   :  { %3322 = vmatprep.subr.bf16.mxu0 %v3644_v21 }
 0x8c0   :  { %v3411_v25 = vpop.permute.xlu1 %3410  ;;  %3131 = vmatmul.mubr.msk.f32.vlgmr.msra.gmra.mrb[30].mxu0 %vm421_vm3, %v1612_v55 }
 0x8c1   :  { %v3413_v3 = vunpack.i.h.bf16 %v3411_v25  ;;  %v3412_v33 = vunpack.i.l.bf16 %v3411_v25  ;;  %3133 = vmatprep.mubr.msk.f32.mxu0 %vm3646_vm2, %v3647_v34 }
 0x8c3   :  { %v3323_v27 = vpack.c.bf16 %v3413_v3, %v3412_v33 }
 0x8c4   :  { %v1887_v4 = vpop.permute.xlu1 %1886  ;;  %3134 = vmatmul.mubr.msk.f32.gmra.mrb[32].mxu0 %vm421_vm3, %v1617_v41 }
 0x8c5   :  { %3325 = vmatpush3.bf16.xpose.msk.msra.mxu0 %vm3819_vm4, %v3323_v27  ;;  %3136 = vmatprep.mubr.msk.f32.mxu0 %vm3646_vm2, %v3647_v34 }
 0x8c6   :  { %3158 = vmatprep.subr.mxu0 %v3647_v34  ;;  %v3416_v7 = vpop.permute.xlu0 %3415 }
 0x8c7   :  { %v3418_v54 = vunpack.i.h.bf16 %v3416_v7  ;;  %v3417_v43 = vunpack.i.l.bf16 %v3416_v7 }
 0x8c8   :  { %v1877_v8 = vpop.permute.xlu1 %1876  ;;  %3137 = vmatmul.mubr.msk.f32.gmra.mrb[34].mxu0 %vm421_vm3, %v4181_v22 }
 0x8c9   :  { %3160 = vmatprep.mubr.msk.f32.mxu0 %vm3646_vm2, %v3647_v34  ;;  %v3330_v10 = vpack.c.bf16 %v3418_v54, %v3417_v43 }
 0x8ca   :  { %v1879_v12 = vpop.permute.xlu0 %1878 }
 0x8cc   :  { %v1881_v9 = vpop.permute.xlu1 %1880 }
 0x8cd   :  { %3159 = vmatpush3.xpose.msk.msra.mxu0 %vm421_vm3, %v1887_v4 }
 0x8ce   :  { %3329 = vmatprep.subr.bf16.mxu0 %v3644_v21  ;;  %v2128_v46 = vpop.permute.xlu0 %2127 }
 0x8d0   :  { %v3421_v35 = vpop.permute.xlu1 %3420  ;;  %3161 = vmatmul.mubr.msk.f32.vlgmr.msra.gmra.mrb[36].mxu0 %vm421_vm3, %v1877_v8 }
 0x8d1   :  { %3332 = vmatpush3.bf16.xpose.msk.msra.mxu0 %vm3819_vm4, %v3330_v10  ;;  %3163 = vmatprep.mubr.msk.f32.mxu0 %vm3646_vm2, %v3647_v34  ;;  %v3423_v47 = vunpack.i.h.bf16 %v3421_v35  ;;  %v3422_v32 = vunpack.i.l.bf16 %v3421_v35 }
 0x8d2   :  { %3188 = vmatprep.subr.mxu0 %v3647_v34  ;;  %v2367_v18 = vpop.permute.xlu0 %2366 }
 0x8d3   :  { %v3337_v17 = vpack.c.bf16 %v3423_v47, %v3422_v32 }
 0x8d4   :  { %v2357_v2 = vpop.permute.xlu1 %2356  ;;  %3164 = vmatmul.mubr.msk.f32.gmra.mrb[38].mxu0 %vm421_vm3, %v1879_v12 }
 0x8d5   :  { %3166 = vmatprep.mubr.msk.f32.mxu0 %vm3646_vm2, %v3647_v34 }
 0x8d8   :  { %v3426_v15 = vpop.permute.xlu1 %3425  ;;  %3167 = vmatmul.mubr.msk.f32.gmra.mrb[40].mxu0 %vm421_vm3, %v1881_v9 }
 0x8d9   :  { %v3428_v42 = vunpack.i.h.bf16 %v3426_v15  ;;  %v3427_v39 = vunpack.i.l.bf16 %v3426_v15  ;;  %3189 = vmatpush3.xpose.msk.msra.mxu0 %vm421_vm3, %v2128_v46  ;;  %3190 = vmatprep.mubr.msk.f32.mxu0 %vm3646_vm2, %v3647_v34 }
 0x8da   :  { %3336 = vmatprep.subr.bf16.mxu0 %v3644_v21 }
 0x8db   :  { %v3320_v57 = vpack.c.bf16 %v3428_v42, %v3427_v39 }
 0x8dc   :  { %3191 = vmatmul.mubr.msk.f32.vlgmr.msra.gmra.mrb[42].mxu0 %vm421_vm3, %v4187_v19 }
 0x8dd   :  { %3321 = vmatpush3.bf16.msra.mxu1 %v3320_v57  ;;  %3339 = vmatpush3.bf16.xpose.msk.msra.mxu0 %vm3819_vm4, %v3337_v17 }
 0x8de   :  { %3193 = vmatprep.mubr.msk.f32.mxu0 %vm3646_vm2, %v3647_v34  ;;  %3218 = vmatprep.subr.mxu0 %v3647_v34 }
 0x8df   :  { %3143 = vmatprep.subr.mxu1 %v3647_v34 }
 0x8e0   :  { %3194 = vmatmul.mubr.msk.f32.gmra.mrb[44].mxu0 %vm421_vm3, %v4189_v29 }
 0x8e1   :  { %3196 = vmatprep.mubr.msk.f32.mxu0 %vm3646_vm2, %v3647_v34 }
 0x8e4   :  { %3197 = vmatmul.mubr.msk.f32.gmra.mrb[46].mxu0 %vm421_vm3, %v4201_v5 }
 0x8e5   :  { %3219 = vmatpush3.xpose.msk.msra.mxu0 %vm421_vm3, %v2367_v18  ;;  %3220 = vmatprep.mubr.msk.f32.mxu0 %vm3646_vm2, %v3647_v34 }
 0x8e6   :  { %3343 = vmatprep.subr.bf16.mxu0 %v3644_v21 }
 0x8e8   :  { %3221 = vmatmul.mubr.msk.f32.vlgmr.msra.gmra.mrb[48].mxu0 %vm421_vm3, %v2357_v2 }
 0x8e9   :  { %3223 = vmatprep.mubr.msk.f32.mxu0 %vm3646_vm2, %v3647_v34 }
 0x993   :  { %v1727_v48 = vpop.f32.mrb[30].mxu0 }
 0x994   :  { %v1741_v24 = vmul.f32 0.25, %v1727_v48  ;;  %v3132_v30 = vpop.f32.mrb[31].mxu0 }
 0x996   :  { %v1744_v26 = vadd.f32 %v1741_v24, %v3881_v11 }
 0x997   :  { %v1732_v40 = vpop.f32.mrb[32].mxu0 }
 0x998   :  { %v1742_v51 = vmul.f32 0.25, %v1732_v40  ;;  %v3135_v45 = vpop.f32.mrb[33].mxu0  ;;  %v1747_v62 = vsel %vm520_vm6, %v1744_v26, -inf }
 0x999   :  { %1748 = vmax.xlane.f32.xlu0 %v1747_v62 }
 0x99a   :  { %v1745_v61 = vadd.f32 %v1742_v51, %v3881_v11 }
 0x99b   :  { %v1737_v49 = vpop.f32.mrb[34].mxu0 }
 0x99c   :  { %v1743_v20 = vmul.f32 0.25, %v1737_v49  ;;  %v3138_v50 = vpop.f32.mrb[35].mxu0  ;;  %v1750_v52 = vsel %vm520_vm6, %v1745_v61, -inf }
 0x99d   :  { %1751 = vmax.xlane.f32.xlu1 %v1750_v52 }
 0x99e   :  { %v1746_v53 = vadd.f32 %v1743_v20, %v3881_v11 }
 0x9a0   :  { %v1753_v1 = vsel %vm520_vm6, %v1746_v53, -inf }
 0x9a1   :  { %1754 = vmax.xlane.f32.xlu0 %v1753_v1 }
 0x9a3   :  { %v1966_v36 = vpop.f32.mrb[36].mxu0 }
 0x9a4   :  { %v1980_v6 = vmul.f32 0.25, %v1966_v36  ;;  %v3162_v23 = vpop.f32.mrb[37].mxu0 }
 0x9a6   :  { %v1983_v41 = vadd.f32 %v1980_v6, %v3881_v11 }
 0x9a7   :  { %v1971_v28 = vpop.f32.mrb[38].mxu0 }
 0x9a8   :  { %v1981_v55 = vmul.f32 0.25, %v1971_v28  ;;  %v3165_v59 = vpop.f32.mrb[39].mxu0  ;;  %v1986_v38 = vsel %vm520_vm6, %v1983_v41, -inf }
 0x9a9   :  { %1987 = vmax.xlane.f32.xlu0 %v1986_v38 }
 0x9aa   :  { %v1984_v58 = vadd.f32 %v1981_v55, %v3881_v11 }
 0x9ab   :  { %v1976_v13 = vpop.f32.mrb[40].mxu0 }
 0x9ac   :  { %v1982_v19 = vmul.f32 0.25, %v1976_v13  ;;  %v3168_v60 = vpop.f32.mrb[41].mxu0  ;;  %v1989_v31 = vsel %vm520_vm6, %v1984_v58, -inf }
 0x9ad   :  { %1990 = vmax.xlane.f32.xlu0 %v1989_v31 }
 0x9ae   :  { %v4281_v63 = vadd.f32 %v1982_v19, %v3881_v11 }
 0x9af   :  { %v2207_v14 = vpop.f32.mrb[42].mxu0 }
 0x9b0   :  { %v3192_v0 = vpop.f32.mrb[43].mxu0  ;;  %v1992_v25 = vsel %vm520_vm6, %v4281_v63, -inf  ;;  %v2221_v2 = vmul.f32 0.25, %v2207_v14 }
 0x9b1   :  { %1993 = vmax.xlane.f32.xlu1 %v1992_v25 }
 0x9b2   :  { %v4300_v32 = vadd.f32 %v2221_v2, %v3881_v11 }
 0x9b3   :  { %v2212_v3 = vpop.f32.mrb[44].mxu0 }
 0x9b4   :  { %v2222_v33 = vmul.f32 0.25, %v2212_v3  ;;  %v3195_v27 = vpop.f32.mrb[45].mxu0  ;;  %v2227_v15 = vsel %vm520_vm6, %v4300_v32, -inf }
 0x9b6   :  { %v4286_v4 = vadd.f32 %v2222_v33, %v3881_v11 }
 0x9b7   :  { %v2217_v7 = vpop.f32.mrb[46].mxu0 }
 0x9b8   :  { %v3198_v8 = vpop.f32.mrb[47].mxu0  ;;  %v2230_v54 = vsel %vm520_vm6, %v4286_v4, -inf  ;;  %v2223_v47 = vmul.f32 0.25, %v2217_v7 }
 0x9b9   :  { %2231 = vmax.xlane.f32.xlu1 %v2230_v54 }
 0x9ba   :  { %v4303_v46 = vadd.f32 %v2223_v47, %v3881_v11 }
 0x9bb   :  { %v2446_v43 = vpop.f32.mrb[48].mxu0 }
 0x9bc   :  { %v2460_v9 = vmul.f32 0.25, %v2446_v43  ;;  %v3222_v10 = vpop.f32.mrb[49].mxu0  ;;  %v2233_v42 = vsel %vm520_vm6, %v4303_v46, -inf }
 0x9be   :  { %v4291_v35 = vadd.f32 %v2460_v9, %v3881_v11 }
 0x9c0   :  { %v2466_v12 = vsel %vm520_vm6, %v4291_v35, -inf }
 0x9c1   :  { %2467 = vmax.xlane.f32.xlu1 %v2466_v12 }
 0x9c3   :  { %1784 = vrot.lane.b32.xlu0 %v4181_v22, %s3651_s8 }
 0x9d2   :  { %2023 = vrot.lane.b32.xlu1 %v4181_v22, %s3652_s9 }
 0x9e2   :  { %2228 = vmax.xlane.f32.xlu0 %v2227_v15 }
 0x9e6   :  { %2234 = vmax.xlane.f32.xlu0 %v2233_v42 }
 0x9fc   :  { %3430 = vrot.lane.b32.xlu0 %v4177_v37, %s3652_s9 }
 0xa26   :  { %v1749_v22 = vpop.xlane.xlu0 %1748 }
 0xa27   :  { %v1756_v39 = vsub.f32 %v1744_v26, %v1749_v22 }
 0xa29   :  { %v1759_v17 = vmul.f32 1.442695, %v1756_v39 }
 0xa2a   :  { %v1752_v57 = vpop.xlane.xlu1 %1751 }
 0xa2b   :  { %3516 = vpow2.f32 %v1759_v17  ;;  %v1757_v18 = vsub.f32 %v1745_v61, %v1752_v57 }
 0xa2d   :  { %v1761_v48 = vmul.f32 1.442695, %v1757_v18 }
 0xa2e   :  { %v1755_v24 = vpop.xlane.xlu0 %1754 }
 0xa2f   :  { %3518 = vpow2.f32 %v1761_v48  ;;  %v1758_v30 = vsub.f32 %v1746_v53, %v1755_v24 }
 0xa31   :  { %v1763_v40 = vmul.f32 1.442695, %v1758_v30 }
 0xa33   :  { %3520 = vpow2.f32 %v1763_v40 }
 0xa35   :  { %v4311_v51 = vpop.eup %3516 }
 0xa36   :  { %v1988_v45 = vpop.xlane.xlu0 %1987  ;;  %v1765_v62 = vsel %vm520_vm6, %v4311_v51, 0.0 }
 0xa37   :  { %v1995_v49 = vsub.f32 %v1983_v41, %v1988_v45  ;;  %1766 = vadd.xlane.f32.xlu0 %v1765_v62 }
 0xa39   :  { %v4315_v37 = vpop.eup %3518  ;;  %v1998_v26 = vmul.f32 1.442695, %v1995_v49 }
 0xa3a   :  { %v1991_v20 = vpop.xlane.xlu0 %1990  ;;  %v1768_v61 = vsel %vm520_vm6, %v4315_v37, 0.0 }
 0xa3b   :  { %3522 = vpow2.f32 %v1998_v26  ;;  %v1996_v50 = vsub.f32 %v1984_v58, %v1991_v20  ;;  %1769 = vadd.xlane.f32.xlu1 %v1768_v61 }
 0xa3d   :  { %v4319_v52 = vpop.eup %3520  ;;  %v2000_v53 = vmul.f32 1.442695, %v1996_v50 }
 0xa3e   :  { %v1785_v1 = vpop.permute.xlu0 %1784  ;;  %v1994_v36 = vpop.xlane.xlu1 %1993  ;;  %v1771_v6 = vsel %vm520_vm6, %v4319_v52, 0.0 }
 0xa3f   :  { %3524 = vpow2.f32 %v2000_v53  ;;  %v1997_v23 = vsub.f32 %v4281_v63, %v1994_v36  ;;  %3144 = vmatpush3.msra.mxu1 %v1785_v1  ;;  %1772 = vadd.xlane.f32.xlu0 %v1771_v6 }
 0xa40   :  { %3326 = vmatprep.subr.bf16.mxu1 %v3644_v21 }
 0xa41   :  { %v2002_v41 = vmul.f32 1.442695, %v1997_v23 }
 0xa43   :  { %3526 = vpow2.f32 %v2002_v41 }
 0xa45   :  { %v4325_v28 = vpop.eup %3522 }
 0xa46   :  { %v2232_v55 = vpop.xlane.xlu1 %2231  ;;  %v2004_v59 = vsel %vm520_vm6, %v4325_v28, 0.0 }
 0xa47   :  { %v2237_v38 = vsub.f32 %v4286_v4, %v2232_v55  ;;  %2005 = vadd.xlane.f32.xlu1 %v2004_v59 }
 0xa49   :  { %v4330_v58 = vpop.eup %3524  ;;  %v2241_v13 = vmul.f32 1.442695, %v2237_v38 }
 0xa4a   :  { %v2007_v19 = vsel %vm520_vm6, %v4330_v58, 0.0 }
 0xa4b   :  { %3528 = vpow2.f32 %v2241_v13  ;;  %2008 = vadd.xlane.f32.xlu0 %v2007_v19 }
 0xa4d   :  { %v4334_v60 = vpop.eup %3526 }
 0xa4e   :  { %v2010_v31 = vsel %vm520_vm6, %v4334_v60, 0.0  ;;  %v2468_v7 = vpop.xlane.xlu1 %2467 }
 0xa4f   :  { %2011 = vadd.xlane.f32.xlu0 %v2010_v31  ;;  %v2475_v8 = vsub.f32 %v4291_v35, %v2468_v7 }
 0xa51   :  { %v2478_v43 = vmul.f32 1.442695, %v2475_v8  ;;  %v2607_v8 = vld [vmem:[#allocation5 + $0xc0] sm:$0xff] }
 0xa55   :  { %v4338_v63 = vpop.eup %3528 }
 0xa56   :  { %v2248_v14 = vsel %vm520_vm6, %v4338_v63, 0.0 }
 0xa57   :  { %2249 = vadd.xlane.f32.xlu1 %v2248_v14 }
 0xa68   :  { %2264 = vrot.lane.b32.xlu1 %v4201_v5, %s3651_s8 }
 0xa6c   :  { %3440 = vrot.lane.b32.xlu1 %v4195_v16, %s3652_s9 }
 0xa6f   :  { %v2229_v0 = vpop.xlane.xlu0 %2228 }
 0xa70   :  { %v2236_v25 = vsub.f32 %v4300_v32, %v2229_v0  ;;  %v2024_v32 = vpop.permute.xlu1 %2023 }
 0xa72   :  { %v2239_v3 = vmul.f32 1.442695, %v2236_v25 }
 0xa73   :  { %v2235_v33 = vpop.xlane.xlu0 %2234 }
 0xa74   :  { %3530 = vpow2.f32 %v2239_v3  ;;  %v2238_v27 = vsub.f32 %v4303_v46, %v2235_v33 }
 0xa76   :  { %v2243_v4 = vmul.f32 1.442695, %v2238_v27 }
 0xa77   :  { %v3431_v35 = vpop.permute.xlu0 %3430 }
 0xa78   :  { %3532 = vpow2.f32 %v2243_v4  ;;  %v3433_v22 = vunpack.i.h.bf16 %v3431_v35  ;;  %v3432_v39 = vunpack.i.l.bf16 %v3431_v35 }
 0xa79   :  { %3534 = vpow2.f32 %v2478_v43 }
 0xa7a   :  { %v3327_v57 = vpack.c.bf16 %v3433_v22, %v3432_v39  ;;  %v2609_v22 = vld [vmem:[#allocation5 + $0xd0] sm:$0xff]  ;;  %v2610_v39 = vld [vmem:[#allocation5 + $0xd8] sm:$0xff] }
 0xa7e   :  { %v4349_v54 = vpop.eup %3530 }
 0xa7f   :  { %v2245_v9 = vsel %vm520_vm6, %v4349_v54, 0.0 }
 0xa80   :  { %2246 = vadd.xlane.f32.xlu0 %v2245_v9 }
 0xa82   :  { %v4353_v10 = vpop.eup %3532 }
 0xa83   :  { %v2251_v12 = vsel %vm520_vm6, %v4353_v10, 0.0  ;;  %v4357_v2 = vpop.eup %3534 }
 0xa84   :  { %2252 = vadd.xlane.f32.xlu0 %v2251_v12  ;;  %v2484_v47 = vsel %vm520_vm6, %v4357_v2, 0.0 }
 0xa90   :  { %2485 = vadd.xlane.f32.xlu1 %v2484_v47 }
 0xa9a   :  { %3435 = vrot.lane.b32.xlu0 %v4195_v16, %s3651_s8 }
 0xaa1   :  { %2503 = vrot.lane.b32.xlu1 %v4201_v5, %s3652_s9 }
 0xaa5   :  { %2358 = vrot.lane.b32.xlu1 %v4189_v29, %s3649_s7 }
 0xaa9   :  { %2360 = vrot.lane.b32.xlu1 %v4201_v5, %s3649_s7 }
 0xac4   :  { %v1767_v46 = vpop.xlane.xlu0 %1766 }
 0xac5   :  { %3536 = vrcp.f32 %v1767_v46 }
 0xac8   :  { %v1770_v15 = vpop.xlane.xlu1 %1769 }
 0xac9   :  { %3538 = vrcp.f32 %v1770_v15 }
 0xacc   :  { %v1773_v42 = vpop.xlane.xlu0 %1772 }
 0xacd   :  { %3540 = vrcp.f32 %v1773_v42 }
 0xacf   :  { %v3537_v16 = vpop.eup %3536 }
 0xad0   :  { %v1777_v17 = vmul.f32 %v3537_v16, %v4311_v51  ;;  %v3347_v16 = vpack.c.bf16 %v2610_v39, %v2609_v22 }
 0xad2   :  { %3146 = vmatmul.mubr.msk.f32.vlgmr.msra.gmra.mrb[36].mxu1 %vm520_vm6, %v1777_v17 }
 0xad3   :  { %v3539_v29 = vpop.eup %3538  ;;  %3328 = vmatpush3.bf16.msra.mxu1 %v3327_v57  ;;  %3148 = vmatprep.mubr.msk.f32.mxu1 %vm3646_vm2, %v3647_v34 }
 0xad4   :  { %v2006_v5 = vpop.xlane.xlu1 %2005  ;;  %3173 = vmatprep.subr.mxu1 %v3647_v34  ;;  %v1778_v18 = vmul.f32 %v3539_v29, %v4315_v37 }
 0xad5   :  { %3542 = vrcp.f32 %v2006_v5 }
 0xad6   :  { %3149 = vmatmul.mubr.msk.f32.gmra.mrb[38].mxu1 %vm520_vm6, %v1778_v18 }
 0xad7   :  { %v3541_v48 = vpop.eup %3540  ;;  %3174 = vmatpush3.msra.mxu1 %v2024_v32  ;;  %3151 = vmatprep.mubr.msk.f32.mxu1 %vm3646_vm2, %v3647_v34 }
 0xad8   :  { %v2009_v24 = vpop.xlane.xlu0 %2008  ;;  %v1779_v30 = vmul.f32 %v3541_v48, %v4319_v52  ;;  %3333 = vmatprep.subr.bf16.mxu1 %v3644_v21 }
 0xad9   :  { %3544 = vrcp.f32 %v2009_v24 }
 0xada   :  { %3152 = vmatmul.mubr.msk.f32.gmra.mrb[40].mxu1 %vm520_vm6, %v1779_v30 }
 0xadb   :  { %3175 = vmatprep.mubr.msk.f32.mxu1 %vm3646_vm2, %v3647_v34 }
 0xadc   :  { %v2012_v40 = vpop.xlane.xlu0 %2011 }
 0xadd   :  { %3546 = vrcp.f32 %v2012_v40 }
 0xadf   :  { %v3543_v51 = vpop.eup %3542 }
 0xae0   :  { %v2016_v45 = vmul.f32 %v3543_v51, %v4325_v28 }
 0xae2   :  { %3176 = vmatmul.mubr.msk.f32.vlgmr.msra.gmra.mrb[42].mxu1 %vm520_vm6, %v2016_v45 }
 0xae3   :  { %v3545_v62 = vpop.eup %3544  ;;  %3178 = vmatprep.mubr.msk.f32.mxu1 %vm3646_vm2, %v3647_v34 }
 0xae4   :  { %v2017_v49 = vmul.f32 %v3545_v62, %v4330_v58  ;;  %v2250_v20 = vpop.xlane.xlu1 %2249 }
 0xae6   :  { %3179 = vmatmul.mubr.msk.f32.gmra.mrb[44].mxu1 %vm520_vm6, %v2017_v49 }
 0xae7   :  { %v3547_v37 = vpop.eup %3546  ;;  %3181 = vmatprep.mubr.msk.f32.mxu1 %vm3646_vm2, %v3647_v34 }
 0xae8   :  { %v2018_v26 = vmul.f32 %v3547_v37, %v4334_v60  ;;  %v2265_v50 = vpop.permute.xlu1 %2264 }
 0xaea   :  { %3182 = vmatmul.mubr.msk.f32.gmra.mrb[46].mxu1 %vm520_vm6, %v2018_v26 }
 0xaeb   :  { %3205 = vmatprep.mubr.msk.f32.mxu1 %vm3646_vm2, %v3647_v34 }
 0xaec   :  { %v3441_v6 = vpop.permute.xlu1 %3440 }
 0xaed   :  { %v3443_v28 = vunpack.i.h.bf16 %v3441_v6  ;;  %v3442_v55 = vunpack.i.l.bf16 %v3441_v6 }
 0xaef   :  { %v3341_v13 = vpack.c.bf16 %v3443_v28, %v3442_v55 }
 0xb0d   :  { %v2247_v61 = vpop.xlane.xlu0 %2246 }
 0xb0e   :  { %3548 = vrcp.f32 %v2247_v61 }
 0xb0f   :  { %3550 = vrcp.f32 %v2250_v20 }
 0xb11   :  { %v2253_v52 = vpop.xlane.xlu0 %2252 }
 0xb12   :  { %3552 = vrcp.f32 %v2253_v52 }
 0xb15   :  { %v3436_v53 = vpop.permute.xlu0 %3435 }
 0xb16   :  { %v3438_v1 = vunpack.i.h.bf16 %v3436_v53  ;;  %v3437_v36 = vunpack.i.l.bf16 %v3436_v53 }
 0xb18   :  { %v3334_v23 = vpack.c.bf16 %v3438_v1, %v3437_v36  ;;  %v3549_v41 = vpop.eup %3548 }
 0xb19   :  { %v2257_v59 = vmul.f32 %v3549_v41, %v4349_v54  ;;  %v3551_v58 = vpop.eup %3550  ;;  %v2608_v54 = vld [vmem:[#allocation5 + $0xc8] sm:$0xff] }
 0xb1a   :  { %3335 = vmatpush3.bf16.msra.mxu1 %v3334_v23  ;;  %v2258_v60 = vmul.f32 %v3551_v58, %v4338_v63  ;;  %v3344_v43 = vpack.c.bf16 %v2608_v54, %v2607_v8 }
 0xb1b   :  { %3203 = vmatprep.subr.mxu1 %v3647_v34 }
 0xb1c   :  { %v3553_v31 = vpop.eup %3552  ;;  %3345 = vmatpush3.bf16.msra.mxu0 %v3344_v43 }
 0xb1d   :  { %v2486_v38 = vpop.xlane.xlu1 %2485  ;;  %v2259_v0 = vmul.f32 %v3553_v31, %v4353_v10  ;;  %3346 = vmatprep.subr.bf16.mxu0 %v3644_v21 }
 0xb1e   :  { %3554 = vrcp.f32 %v2486_v38  ;;  %3204 = vmatpush3.msra.mxu1 %v2265_v50 }
 0xb1f   :  { %3206 = vmatmul.mubr.msk.f32.vlgmr.msra.gmra.mrb[48].mxu1 %vm520_vm6, %v2257_v59  ;;  %3340 = vmatprep.subr.bf16.mxu1 %v3644_v21 }
 0xb20   :  { %3342 = vmatpush3.bf16.msra.mxu1 %v3341_v13  ;;  %3208 = vmatprep.mubr.msk.f32.mxu1 %vm3646_vm2, %v3647_v34 }
 0xb21   :  { %v2504_v19 = vpop.permute.xlu1 %2503  ;;  %3233 = vmatprep.subr.mxu1 %v3647_v34  ;;  %3348 = vmatpush3.bf16.msra.mxu0 %v3347_v16 }
 0xb23   :  { %3209 = vmatmul.mubr.msk.f32.gmra.mrb[50].mxu1 %vm520_vm6, %v2258_v60 }
 0xb24   :  { %3234 = vmatpush3.msra.mxu1 %v2504_v19  ;;  %3211 = vmatprep.mubr.msk.f32.mxu1 %vm3646_vm2, %v3647_v34  ;;  %v2808_v19 = vld [vmem:[#allocation5 + $0xe0] ss:$0 sm:$0xff] }
 0xb25   :  { %v2359_v14 = vpop.permute.xlu1 %2358 }
 0xb26   :  { %3224 = vmatmul.mubr.msk.f32.gmra.mrb[50].mxu0 %vm421_vm3, %v2359_v14 }
 0xb27   :  { %3212 = vmatmul.mubr.msk.f32.gmra.mrb[52].mxu1 %vm520_vm6, %v2259_v0  ;;  %3226 = vmatprep.mubr.msk.f32.mxu0 %vm3646_vm2, %v3647_v34 }
 0xb28   :  { %v3555_v63 = vpop.eup %3554  ;;  %3235 = vmatprep.mubr.msk.f32.mxu1 %vm3646_vm2, %v3647_v34 }
 0xb29   :  { %v2496_v25 = vmul.f32 %v3555_v63, %v4357_v2  ;;  %v2361_v3 = vpop.permute.xlu1 %2360 }
 0xb2a   :  { %3227 = vmatmul.mubr.msk.f32.gmra.mrb[52].mxu0 %vm421_vm3, %v2361_v3 }
 0xb2b   :  { %3236 = vmatmul.mubr.msk.f32.vlgmr.msra.gmra.mrb[54].mxu1 %vm520_vm6, %v2496_v25  ;;  %3252 = vmatprep.mubr.msk.f32.mxu0 %vm3646_vm2, %v3647_v34 }
 0xb2c   :  { %3238 = vmatprep.mubr.msk.f32.mxu1 %vm3646_vm2, %v3647_v34 }
 0xba5   :  { %v1864_v33 = vpop.f32.mrb[36].mxu1 }
 0xba6   :  { %v3147_v27 = vpop.f32.mrb[37].mxu1 }
 0xba9   :  { %v1869_v4 = vpop.f32.mrb[38].mxu1 }
 0xbaa   :  { %v3150_v7 = vpop.f32.mrb[39].mxu1 }
 0xbad   :  { %v1873_v9 = vpop.f32.mrb[40].mxu1 }
 0xbae   :  { %v3153_v10 = vpop.f32.mrb[41].mxu1 }
 0xbb5   :  { %v2103_v12 = vpop.f32.mrb[42].mxu1 }
 0xbb6   :  { %2116 = vrot.lane.b32.xlu1 %v2103_v12, %s3653_s10  ;;  %v3177_v2 = vpop.f32.mrb[43].mxu1 }
 0xbb9   :  { %v2108_v47 = vpop.f32.mrb[44].mxu1 }
 0xbba   :  { %v3180_v35 = vpop.f32.mrb[45].mxu1 }
 0xbbd   :  { %v2112_v32 = vpop.f32.mrb[46].mxu1 }
 0xbbe   :  { %v3183_v46 = vpop.f32.mrb[47].mxu1 }
 0xbf2   :  { %v2344_v15 = vpop.f32.mrb[48].mxu1 }
 0xbf3   :  { %v3207_v42 = vpop.f32.mrb[49].mxu1 }
 0xbf6   :  { %v2349_v17 = vpop.f32.mrb[50].mxu1 }
 0xbf7   :  { %v3210_v57 = vpop.f32.mrb[51].mxu1 }
 0xbf9   :  { %v2451_v29 = vpop.f32.mrb[50].mxu0 }
 0xbfa   :  { %v2353_v5 = vpop.f32.mrb[52].mxu1  ;;  %v3225_v18 = vpop.f32.mrb[51].mxu0  ;;  %v2461_v49 = vmul.f32 0.25, %v2451_v29 }
 0xbfb   :  { %v3213_v21 = vpop.f32.mrb[53].mxu1 }
 0xbfc   :  { %v2464_v37 = vadd.f32 %v2461_v49, %v3881_v11 }
 0xbfd   :  { %v2456_v48 = vpop.f32.mrb[52].mxu0 }
 0xbfe   :  { %v2462_v24 = vmul.f32 0.25, %v2456_v48  ;;  %v3228_v30 = vpop.f32.mrb[53].mxu0  ;;  %v2583_v40 = vpop.f32.mrb[54].mxu1  ;;  %v2469_v26 = vsel %vm520_vm6, %v2464_v37, -inf }
 0xbff   :  { %2596 = vrot.lane.b32.xlu0 %v2583_v40, %s3653_s10  ;;  %v3237_v51 = vpop.f32.mrb[55].mxu1 }
 0xc00   :  { %v2465_v45 = vadd.f32 %v2462_v24, %v3881_v11 }
 0xc02   :  { %v2472_v62 = vsel %vm520_vm6, %v2465_v45, -inf }
 0xc03   :  { %2473 = vmax.xlane.f32.xlu1 %v2472_v62 }
 0xc1e   :  { %2470 = vmax.xlane.f32.xlu0 %v2469_v26 }
 0xc28   :  { %v2117_v20 = vpop.permute.xlu1 %2116 }
 0xc29   :  { %v2119_v50 = vsel %vm421_vm3, %v1864_v33, %v2117_v20 }
 0xc2a   :  { %v2600_v1 = vadd.f32 %v2119_v50, %v4083_v56 }
 0xc71   :  { %v2597_v61 = vpop.permute.xlu0 %2596 }
 0xc72   :  { %v2599_v52 = vsel %vm421_vm3, %v2344_v15, %v2597_v61 }
 0xc73   :  { %v2601_v53 = vadd.f32 %v2599_v52, %v4110_v44 }
 0xc75   :  { %v2603_v36 = vrot.slane %v2601_v53, 7 }
 0xc77   :  { %v2606_v6 = vsel %vm2605_vm7, %v2600_v1, %v2603_v36 }
 0xc78   :  { %3253 = vmatmul.mubr.msk.f32.vlgmr.msra.gmra.mrb[54].mxu0 %vm183_vm1, %v2606_v6 }
 0xc90   :  { %v2474_v23 = vpop.xlane.xlu1 %2473 }
 0xc91   :  { %v2477_v11 = vsub.f32 %v2465_v45, %v2474_v23 }
 0xc93   :  { %v2482_v55 = vmul.f32 1.442695, %v2477_v11 }
 0xcab   :  { %v2471_v41 = vpop.xlane.xlu0 %2470 }
 0xcac   :  { %v2476_v28 = vsub.f32 %v2464_v37, %v2471_v41 }
 0xcae   :  { %v2480_v59 = vmul.f32 1.442695, %v2476_v28 }
 0xcb0   :  { %3556 = vpow2.f32 %v2480_v59 }
 0xcb1   :  { %3558 = vpow2.f32 %v2482_v55 }
 0xcba   :  { %v3557_v38 = vpop.eup %3556 }
 0xcbb   :  { %v2487_v58 = vsel %vm520_vm6, %v3557_v38, 0.0  ;;  %v3559_v13 = vpop.eup %3558 }
 0xcbc   :  { %2488 = vadd.xlane.f32.xlu0 %v2487_v58  ;;  %v2490_v44 = vsel %vm520_vm6, %v3559_v13, 0.0 }
 0xcc0   :  { %2491 = vadd.xlane.f32.xlu0 %v2490_v44 }
 0xd49   :  { %v2489_v56 = vpop.xlane.xlu0 %2488 }
 0xd4a   :  { %3560 = vrcp.f32 %v2489_v56 }
 0xd4b   :  { %v2685_v60 = vpop.f32.mrb[54].mxu0 }
 0xd4c   :  { %v2686_v31 = vadd.f32 %v2808_v19, %v2685_v60  ;;  %v3254_v14 = vpop.f32.mrb[55].mxu0 }
 0xd4d   :  { %v2492_v0 = vpop.xlane.xlu0 %2491 }
 0xd4e   :  { %3562 = vrcp.f32 %v2492_v0  ;;  %v2690_v63 = vsel %vm2689_vm8, %v2686_v31, -inf }
 0xd4f   :  { %2691 = vmax.xlane.f32.xlu0 %v2690_v63 }
 0xd54   :  { %v3561_v25 = vpop.eup %3560 }
 0xd55   :  { %v2497_v3 = vmul.f32 %v3561_v25, %v3557_v38 }
 0xd57   :  { %3239 = vmatmul.mubr.msk.f32.gmra.mrb[56].mxu1 %vm520_vm6, %v2497_v3 }
 0xd58   :  { %v3563_v33 = vpop.eup %3562  ;;  %3241 = vmatprep.mubr.msk.f32.mxu1 %vm3646_vm2, %v3647_v34 }
 0xd59   :  { %v2498_v27 = vmul.f32 %v3563_v33, %v3559_v13 }
 0xd5b   :  { %3242 = vmatmul.mubr.msk.f32.gmra.mrb[58].mxu1 %vm520_vm6, %v2498_v27 }
 0xddc   :  { %v2692_v4 = vpop.xlane.xlu0 %2691 }
 0xddd   :  { %v2693_v7 = vsub.f32 %v2686_v31, %v2692_v4 }
 0xddf   :  { %v2694_v8 = vmul.f32 1.442695, %v2693_v7 }
 0xde1   :  { %3564 = vpow2.f32 %v2694_v8 }
 0xdeb   :  { %v3565_v54 = vpop.eup %3564 }
 0xdec   :  { %v2696_v43 = vsel %vm2689_vm8, %v3565_v54, 0.0 }
 0xded   :  { %2697 = vadd.xlane.f32.xlu1 %v2696_v43 }
 0xe2a   :  { %v2588_v9 = vpop.f32.mrb[56].mxu1 }
 0xe2b   :  { %v3240_v10 = vpop.f32.mrb[57].mxu1 }
 0xe2e   :  { %v2592_v12 = vpop.f32.mrb[58].mxu1 }
 0xe2f   :  { %v3243_v2 = vpop.f32.mrb[59].mxu1 }
 0xe7a   :  { %v2698_v47 = vpop.xlane.xlu1 %2697 }
 0xe7b   :  { %3566 = vrcp.f32 %v2698_v47 }
 0xe85   :  { %v3567_v34 = vpop.eup %3566 }
 0xe86   :  { %v2700_v35 = vmul.f32 %v3567_v34, %v3565_v54 }
 0xe88   :  { %2701 = vst [vmem:[#allocation7] sm:$0x3] %v2700_v35 }
 0xe89   :  { %3623 = shalt.err (!%p3620_p6)
}
 0xe8a   :  { %s3624_s16 = scalar_lea.hbm %s4454_s2, 32 }
 0xe8b   :  { %p3625_p7 = scmp.ne.s32.totalorder %s4454_s2, %s3624_s16  ;;  %p3628_p8 = scmp.lt.u32.totalorder %s3624_s16, %s4454_s2 }
 0xe8d   :  { %p3630_p9 = pnand %p3628_p8, %p3625_p7 }
 0xe8f   :  { %3633 = shalt.err (!%p3630_p9)
}
 0xe90   :  { %2711 = dma.vmem_to_hbm [thread:$0]  %s2709_s12, 32, %s4454_s2, [#allocation4]  }
 0xe91   :  { %3638 = dma.done.wait [#allocation4], 32  }
 0xe92   :  { %3639 = vsyncadd [#allocation4], 4294967264 }
 0xe93   :  { %2715 = vsyncpa [#allocation3], 1 }
 0xe94   :  { %2716 = vsyncpa [#allocation6], 1 }
 0xe95   :  { %2717 = vsyncpa [#allocation4], 1 }

</bundles_post_ra>
